<compile_context>
chip_gen: v7x
topology: tpu7x:2x2x1
jax: 0.10.0
libtpu: 0.0.40
codegen_flags: <defaults>
</compile_context>

<pallas_src>
from functools import partial

import jax
import jax.numpy as jnp
from jax.experimental import pallas as pl
from jax.experimental.pallas import tpu as pltpu


def _tree_sum(parts):
    # Pairwise tree reduction -> ILP across the VALU slots instead of one chain.
    while len(parts) > 1:
        nxt = [parts[i] + parts[i + 1] for i in range(0, len(parts) - 1, 2)]
        if len(parts) % 2:
            nxt.append(parts[-1])
        parts = nxt
    return parts[0]


def _win_slice(a, axis, j, n_out, stride):
    """Static window slice of a value: indices j, j+S, ..., j+(n_out-1)*S."""
    idx = [slice(None)] * a.ndim
    if stride == 1:
        idx[axis] = slice(j, j + n_out)
    else:
        idx[axis] = slice(j, j + (n_out - 1) * stride + 1, stride)
    return a[tuple(idx)]


def _avgpool4d_kernel(x_ref, o_ref, *scratch, K, S, P, O, X):
    # x_ref : (bc, T, D, H, W)        natural-layout block (no HBM relayout)
    # o_ref : (bc, OT, OD, OH, OW)
    T, D, H, W = X
    K0, K1, K2, K3 = K
    OT, OD, OH, OW = O

    if P > 0:
        xp_ref = scratch[0]                       # (bc, Tp, Dp, Hp, Wp)
        bc, Tp, Dp, Hp, Wp = xp_ref.shape
        zdt = xp_ref.dtype
        # Zero ONLY the 2*P halo faces (count_include_pad=True); the interior
        # is overwritten below, so no full-volume zero fill is needed.
        xp_ref[:, :P, :, :, :] = jnp.zeros((bc, P, Dp, Hp, Wp), zdt)
        xp_ref[:, Tp - P:, :, :, :] = jnp.zeros((bc, P, Dp, Hp, Wp), zdt)
        xp_ref[:, :, :P, :, :] = jnp.zeros((bc, Tp, P, Hp, Wp), zdt)
        xp_ref[:, :, Dp - P:, :, :] = jnp.zeros((bc, Tp, P, Hp, Wp), zdt)
        xp_ref[:, :, :, :P, :] = jnp.zeros((bc, Tp, Dp, P, Wp), zdt)
        xp_ref[:, :, :, Hp - P:, :] = jnp.zeros((bc, Tp, Dp, P, Wp), zdt)
        xp_ref[:, :, :, :, :P] = jnp.zeros((bc, Tp, Dp, Hp, P), zdt)
        xp_ref[:, :, :, :, Wp - P:] = jnp.zeros((bc, Tp, Dp, Hp, P), zdt)
        # Copy the un-padded block into the interior window.
        xp_ref[:, P:P + T, P:P + D, P:P + H, P:P + W] = x_ref[...]
        src = xp_ref
    else:
        src = x_ref

    # ---- pass 1: pool T directly from the (padded) ref; fuse the f32 cast
    #      into the per-window loads (no full-volume f32 materialization). ----
    def t_slice(j):
        if S == 1:
            return src[:, j:j + OT, :, :, :].astype(jnp.float32)
        return src[:, j:j + (OT - 1) * S + 1:S, :, :, :].astype(jnp.float32)

    acc = _tree_sum([t_slice(j) for j in range(K0)])          # (bc,OT,Dp,Hp,Wp)

    # ---- pass 2: pool D (leading dim of the value: offset-only slices). -----
    acc = _tree_sum([_win_slice(acc, 2, j, OD, S) for j in range(K1)])

    inv = 1.0 / float(K0 * K1 * K2 * K3)

    # ---- passes 3+4: pool H and W fused with the final scale + cast + store
    #      (no post-H intermediate; o_ref is written exactly once). -----------
    if K2 * K3 <= 16:
        parts = []
        for jh in range(K2):
            row = _win_slice(acc, 3, jh, OH, S)
            for jw in range(K3):
                parts.append(_win_slice(row, 4, jw, OW, S))
        win = _tree_sum(parts)
    else:  # large windows: keep the separable form (fewer relayout copies)
        acc = _tree_sum([_win_slice(acc, 3, jh, OH, S) for jh in range(K2)])
        win = _tree_sum([_win_slice(acc, 4, jw, OW, S) for jw in range(K3)])

    o_ref[...] = (win * inv).astype(o_ref.dtype)


def _round_up(n, m):
    return ((n + m - 1) // m) * m


def _vmem_bytes(shape, itemsize):
    """VMEM footprint of a buffer including (sublane, lane) vreg padding."""
    dims = list(shape)
    if len(dims) >= 1:
        dims[-1] = _round_up(dims[-1], 128)
    if len(dims) >= 2:
        dims[-2] = _round_up(dims[-2], 8)
    n = 1
    for d in dims:
        n *= int(d)
    return n * itemsize


def avg_pool4d(x, kernel_size, stride: int = 1, padding: int = 0):
    """Pallas implementation of AvgPool4d.forward.

    x: (B, C, T, D, H, W)  ->  (B, C, OT, OD, OH, OW)
    """
    assert len(kernel_size) == 4, "kernel_size must have 4 entries"
    B, C, T, D, H, W = x.shape
    K = tuple(int(k) for k in kernel_size)
    S, P = int(stride), int(padding)
    X_size = (T, D, H, W)
    O = tuple((X_size[i] + 2 * P - K[i]) // S + 1 for i in range(4))
    OT, OD, OH, OW = O
    BC = B * C

    # Natural layout: (B, C, ...) -> (B*C, ...) is a free, contiguous reshape.
    # No HBM transpose on input or output.
    xr = x.reshape(BC, T, D, H, W)

    itemsize = jnp.dtype(x.dtype).itemsize
    Tp, Dp, Hp, Wp = (X_size[i] + 2 * P for i in range(4))

    # ---- per-(B*C)-row VMEM estimate (with vreg padding of the minor dims) --
    in_row = _vmem_bytes((T, D, H, W), itemsize)
    out_row = _vmem_bytes((OT, OD, OH, OW), itemsize)
    pad_row = _vmem_bytes((Tp, Dp, Hp, Wp), itemsize) if P > 0 else 0
    # The first pooling pass holds ~(K0+1) f32 slabs of the post-T volume.
    pass1_row = (K[0] + 1) * _vmem_bytes((OT, Dp, Hp, Wp), 4)
    per_row = 2 * (in_row + out_row) + pad_row + pass1_row

    # ---- generation-aware VMEM budget (v7x: 64 MiB, v5e/v6e: 128 MiB) -------
    try:
        vmem_phys = int(pltpu.get_tpu_info().vmem_capacity_bytes)
    except Exception:
        vmem_phys = 64 << 20                     # conservative (v7x) fallback
    vmem_cap = (vmem_phys * 3) // 4              # ~48 MiB v7x, ~96 MiB v5e/v6e
    budget = max(vmem_cap - (4 << 20), 8 << 20)

    # ---- choose how many (B*C) rows to process per grid step ----------------
    rows = max(1, min(BC, budget // max(per_row, 1)))
    # ~<=4 MiB per-step input block already sits near the HBM roofline; keep
    # >= 4 grid steps when possible so inbound DMAs overlap compute.
    rows = min(rows, max(1, (4 << 20) // max(in_row, 1)))
    if BC >= 4:
        rows = min(rows, BC // 4)
    rows = max(rows, 1)
    while BC % rows != 0:
        rows -= 1
    grid = (BC // rows,)

    vmem_need = rows * per_row
    vmem_limit = int(min(vmem_cap, max(vmem_need + (4 << 20), 32 << 20)))

    scratch_shapes = []
    if P > 0:
        scratch_shapes.append(pltpu.VMEM((rows, Tp, Dp, Hp, Wp), x.dtype))

    kern = partial(_avgpool4d_kernel, K=K, S=S, P=P, O=O, X=X_size)
    out = pl.pallas_call(
        kern,
        out_shape=jax.ShapeDtypeStruct((BC, OT, OD, OH, OW), x.dtype),
        grid_spec=pltpu.PrefetchScalarGridSpec(
            num_scalar_prefetch=0,
            grid=grid,
            in_specs=[
                pl.BlockSpec((rows, T, D, H, W), lambda i: (i, 0, 0, 0, 0)),
            ],
            out_specs=pl.BlockSpec((rows, OT, OD, OH, OW),
                                   lambda i: (i, 0, 0, 0, 0)),
            scratch_shapes=scratch_shapes,
        ),
        compiler_params=pltpu.CompilerParams(
            dimension_semantics=("parallel",),
            vmem_limit_bytes=vmem_limit,
        ),
    )(xr)

    # Free, contiguous reshape back to the module's output layout.
    return out.reshape(B, C, OT, OD, OH, OW)


def _reference(x, K, S, P):
    # Pure-JAX reference: zero-padded 4-D window-sum / prod(K)
    # (== separable AvgPool3d + AvgPool1d with count_include_pad=True).
    pad = ((0, 0), (0, 0), (P, P), (P, P), (P, P), (P, P))
    s = jax.lax.reduce_window(
        x.astype(jnp.float32),
        0.0,
        jax.lax.add,
        window_dimensions=(1, 1) + tuple(K),
        window_strides=(1, 1, S, S, S, S),
        padding=pad,
    )
    return (s / float(K[0] * K[1] * K[2] * K[3])).astype(x.dtype)


if __name__ == "__main__":
    key = jax.random.PRNGKey(0)
    # Small shapes consistent with the module: (B, C, T, D, H, W)
    B, C, T, D, H, W = 2, 4, 8, 8, 8, 8
    x = jax.random.normal(key, (B, C, T, D, H, W), dtype=jnp.float32)

    kernel_size = (2, 2, 2, 2)

    # Case 1: module defaults (stride=1, padding=0).
    out = avg_pool4d(x, kernel_size, stride=1, padding=0)
    out = jax.block_until_ready(out)
    ref = _reference(x, kernel_size, 1, 0)
    assert out.shape == (B, C, 7, 7, 7, 7), out.shape
    assert jnp.allclose(out, ref, atol=1e-5, rtol=1e-5)

    # Case 2: padded path (exercises the halo-zeroed VMEM scratch).
    out_p = avg_pool4d(x, kernel_size, stride=1, padding=1)
    out_p = jax.block_until_ready(out_p)
    ref_p = _reference(x, kernel_size, 1, 1)
    assert out_p.shape == (B, C, 9, 9, 9, 9), out_p.shape
    assert jnp.allclose(out_p, ref_p, atol=1e-5, rtol=1e-5)

    print("KERNEL_OK")
</pallas_src>

<mosaic_0001>
module attributes {stable_mosaic.version = 11 : i64} {
  func.func @_avgpool4d_kernel(%arg0: i32, %arg1: memref<2x8x8x8x8xf32, #tpu.memory_space<vmem>>, %arg2: memref<2x7x7x7x7xf32, #tpu.memory_space<vmem>>) attributes {dimension_semantics = [#tpu.dimension_semantics<parallel>], iteration_bounds = array<i64: 4>, scalar_prefetch = 0 : i64, scratch_operands = 0 : i64, tpu.core_type = #tpu.core_type<tc>, window_params = [{transform_indices = @transform_0, window_bounds = array<i64: 2, 8, 8, 8, 8>}, {transform_indices = @transform_1, window_bounds = array<i64: 2, 7, 7, 7, 7>}]} {
    %c0 = arith.constant 0 : index
    %c0_0 = arith.constant 0 : index
    %c0_1 = arith.constant 0 : index
    %c0_2 = arith.constant 0 : index
    %c0_3 = arith.constant 0 : index
    %0 = vector.load %arg1[%c0, %c0_0, %c0_1, %c0_2, %c0_3] : memref<2x8x8x8x8xf32, #tpu.memory_space<vmem>>, vector<2x7x8x8x8xf32>
    %c0_4 = arith.constant 0 : index
    %c1 = arith.constant 1 : index
    %c0_5 = arith.constant 0 : index
    %c0_6 = arith.constant 0 : index
    %c0_7 = arith.constant 0 : index
    %1 = vector.load %arg1[%c0_4, %c1, %c0_5, %c0_6, %c0_7] : memref<2x8x8x8x8xf32, #tpu.memory_space<vmem>>, vector<2x7x8x8x8xf32>
    %2 = arith.addf %0, %1 : vector<2x7x8x8x8xf32>
    %3 = vector.extract_strided_slice %2 {offsets = [0, 0, 0, 0, 0], sizes = [2, 7, 7, 8, 8], strides = [1, 1, 1, 1, 1]} : vector<2x7x8x8x8xf32> to vector<2x7x7x8x8xf32>
    %4 = vector.extract_strided_slice %2 {offsets = [0, 0, 1, 0, 0], sizes = [2, 7, 7, 8, 8], strides = [1, 1, 1, 1, 1]} : vector<2x7x8x8x8xf32> to vector<2x7x7x8x8xf32>
    %5 = arith.addf %3, %4 : vector<2x7x7x8x8xf32>
    %6 = vector.extract_strided_slice %5 {offsets = [0, 0, 0, 0, 0], sizes = [2, 7, 7, 7, 8], strides = [1, 1, 1, 1, 1]} : vector<2x7x7x8x8xf32> to vector<2x7x7x7x8xf32>
    %7 = vector.extract_strided_slice %6 {offsets = [0, 0, 0, 0, 0], sizes = [2, 7, 7, 7, 7], strides = [1, 1, 1, 1, 1]} : vector<2x7x7x7x8xf32> to vector<2x7x7x7x7xf32>
    %8 = vector.extract_strided_slice %6 {offsets = [0, 0, 0, 0, 1], sizes = [2, 7, 7, 7, 7], strides = [1, 1, 1, 1, 1]} : vector<2x7x7x7x8xf32> to vector<2x7x7x7x7xf32>
    %9 = vector.extract_strided_slice %5 {offsets = [0, 0, 0, 1, 0], sizes = [2, 7, 7, 7, 8], strides = [1, 1, 1, 1, 1]} : vector<2x7x7x8x8xf32> to vector<2x7x7x7x8xf32>
    %10 = vector.extract_strided_slice %9 {offsets = [0, 0, 0, 0, 0], sizes = [2, 7, 7, 7, 7], strides = [1, 1, 1, 1, 1]} : vector<2x7x7x7x8xf32> to vector<2x7x7x7x7xf32>
    %11 = vector.extract_strided_slice %9 {offsets = [0, 0, 0, 0, 1], sizes = [2, 7, 7, 7, 7], strides = [1, 1, 1, 1, 1]} : vector<2x7x7x7x8xf32> to vector<2x7x7x7x7xf32>
    %12 = arith.addf %7, %8 : vector<2x7x7x7x7xf32>
    %13 = arith.addf %10, %11 : vector<2x7x7x7x7xf32>
    %14 = arith.addf %12, %13 : vector<2x7x7x7x7xf32>
    %cst = arith.constant 6.250000e-02 : f32
    %15 = vector.broadcast %cst : f32 to vector<2x7x7x7x7xf32>
    %16 = arith.mulf %14, %15 : vector<2x7x7x7x7xf32>
    %c0_8 = arith.constant 0 : index
    %c0_9 = arith.constant 0 : index
    %c0_10 = arith.constant 0 : index
    %c0_11 = arith.constant 0 : index
    %c0_12 = arith.constant 0 : index
    %17 = vector.load %arg2[%c0_8, %c0_9, %c0_10, %c0_11, %c0_12] : memref<2x7x7x7x7xf32, #tpu.memory_space<vmem>>, vector<2x7x7x7x7xf32>
    tpu.vector_store %arg2[%c0_8, %c0_9, %c0_10, %c0_11, %c0_12], %16 {strides = array<i32>} : memref<2x7x7x7x7xf32, #tpu.memory_space<vmem>>, vector<2x7x7x7x7xf32>,
    return
  }
  func.func @transform_0(%arg0: i32) -> (i32, i32, i32, i32, i32) {
    %c0_i32 = arith.constant 0 : i32
    %c0_i32_0 = arith.constant 0 : i32
    %c0_i32_1 = arith.constant 0 : i32
    %c0_i32_2 = arith.constant 0 : i32
    %c0_i32_3 = arith.constant 0 : i32
    return %arg0, %c0_i32, %c0_i32_0, %c0_i32_1, %c0_i32_2 : i32, i32, i32, i32, i32
  }
  func.func @transform_1(%arg0: i32) -> (i32, i32, i32, i32, i32) {
    %c0_i32 = arith.constant 0 : i32
    %c0_i32_0 = arith.constant 0 : i32
    %c0_i32_1 = arith.constant 0 : i32
    %c0_i32_2 = arith.constant 0 : i32
    %c0_i32_3 = arith.constant 0 : i32
    return %arg0, %c0_i32, %c0_i32_0, %c0_i32_1, %c0_i32_2 : i32, i32, i32, i32, i32
  }
}

</mosaic_0001>

<bundles_post_ra>
// kernel: tpu_custom_call.1
= control target key start
LH: loop header
LB: loop body
LE: loop exit
PB: predicated region body
PF: predicated region fallthrough
CT: control target
= control target key end

     0   :  { %6 = vsyncpa [#allocation3], 0  ;;  %s3040_s0 = inlined_call_operand.hbm [shape: f32[8,8,8,8,8], index: 0, kind: input, shape index: {}]   ;;  %s3041_s1 = inlined_call_operand.vmem [shape: f32[8,7,7,7,7], index: 1, kind: output, shape index: {}]  }
   0x1   :  { %8 = vsyncpa [#allocation3 + $0x1], 0  ;;  %s1976_s6 = smov 0   ;;  %s1978_s7 = smov 0  }
   0x2   :  { %s1980_s8 = smov 0   ;;  %s1982_s9 = smov 0  }
   0x3 LB: > { %s1725_s10 = sadd.s32 4294967295, %s1960_s9   ;;  %s1996_s11 = sadd.s32 1, %s1960_s9   ;;  %s1960_s9 = sphi %s1982_s9, %s3123_s9   ;;  %s1956_s8 = sphi %s1980_s8, %s3122_s8   ;;  %s1952_s7 = sphi %s1978_s7, %s3121_s7   ;;  %s1948_s6 = sphi %s1976_s6, %s3120_s6  }
   0x4   : > { %s18_s12 = ssub.s32 %s1960_s9, %s1996_s11  ;;  %s21_s13 = sadd.s32 1, %s1956_s8 }
   0x5   : > { %p19_p0 = scmp.eq.s32.totalorder %s18_s12, 0  ;;  %p28_p1 = scmp.ne.s32.totalorder %s1956_s8, %s1952_s7 }
   0x6   : > { %p29_p2 = scmp.eq.s32.totalorder %s1960_s9, 0  ;;  %p34_p3 = scmp.ne.s32.totalorder %s1952_s7, %s1948_s6 }
   0x7   : > { %s2006_s14 = scalar_select %p19_p0, %s1956_s8, %s21_s13  }
   0x8   : > { %p30_p4 = por %p29_p2, %p28_p1  ;;  %p35_p5 = scmp.eq.s32.totalorder %s1725_s10, 0 }
   0x9   : > { %p1860_p6 = scmp.lt.s32.totalorder %s1960_s9, 4  ;;  %s84_s16 = sand.u32 1, %s1956_s8  }
   0xa   : > { %p2011_p7 = por %p35_p5, %p34_p3  ;;  %s1729_s17 = sshll.u32 %s84_s16, 10 }
   0xb   : > { %s1852_s18 = sshll.u32 %s1960_s9, 14  ;;  %s88_s22 = scalar_lea.vmem [#allocation2], %s1729_s17 }
   0xc   : > { %s2020_s21 = scalar_lea.hbm %s3040_s0, %s1852_s18  ;;  %s96_s23 = sshll.u32 %s88_s22, 4  ;;  %s2022_s23 = int_to_ptr.vmem [resolvable:$true] %s96_s23 }
   0xd   : > { %p2024_p8 = pnand %p1860_p6, %p30_p4  ;;  %s2029_s25 = scalar_lea.sflag [#allocation3], %s84_s16 }
   0xe   : > { %s1896_s26 = scalar_lea.hbm %s2020_s21, 16384  ;;  %s1901_s29 = scalar_lea.hbm %s3040_s0, 65536 }
   0xf   : > { %p1897_p10 = scmp.ne.s32.totalorder %s2020_s21, %s1896_s26  ;;  %p1898_p11 = pneg %p2024_p8 }
  0x10   : > { %p1902_p0 = scmp.lt.u32.totalorder %s2020_s21, %s3040_s0  ;;  %p1903_p1 = scmp.lt.u32.totalorder %s1901_s29, %s1896_s26 }
  0x11   : > { %p1899_p12 = pnand %p1898_p11, %p1897_p10  ;;  %p1905_p3 = scmp.lt.u32.totalorder %s1896_s26, %s2020_s21 }
  0x12   : > { %p1904_p2 = por %p1903_p1, %p1902_p0 }
  0x13   : > { %p1900_p13 = pneg %p1899_p12 }
  0x14   : > { %p1906_p4 = por %p1905_p3, %p1904_p2 }
  0x16   : > { %p1907_p5 = pnand %p1906_p4, %p1900_p13 }
  0x18   : > { %1910 = shalt.err (!%p1907_p5)
}
  0x19   : > { %s1911_s3 = scalar_lea.vmem %s2022_s23, 16384  ;;  %s1962_s4 = smov [#allocation2]  }
  0x1a   : > { %p1912_p6 = scmp.ne.s32.totalorder %s2022_s23, %s1911_s3  ;;  %s1916_s5 = sshll.u32 %s1962_s4, 4  ;;  %s1917_s5 = int_to_ptr.vmem [resolvable:$false] %s1916_s5 }
  0x1b   : > { %s1918_s6 = scalar_lea.vmem %s1917_s5, 32768  ;;  %p1919_p9 = scmp.lt.s32.totalorder %s2022_s23, %s1917_s5 }
  0x1c   : > { %p1914_p10 = pnand %p1912_p6, %p1898_p11  ;;  %p1920_p0 = scmp.lt.s32.totalorder %s1918_s6, %s1911_s3 }
  0x1e   : > { %p1915_p12 = pneg %p1914_p10  ;;  %p1921_p1 = por %p1920_p0, %p1919_p9 }
  0x20   : > { %p1922_p2 = pnand %p1921_p1, %p1915_p12 }
  0x22   : > { %1925 = shalt.err (!%p1922_p2)
}
  0x23   : > { %s1963_s12 = smov 128   ;;  %s1964_s13 = smov 8  }
  0x24   : > { %1859 = dma.hbm_to_vmem [thread:$0]  (!%p2024_p8), %s2020_s21, 16384, %s2022_s23, %s2029_s25, %s1963_s12, %s1963_s12, %s1964_s13  }
  0x25   : > { %p104_p11 = scmp.lt.s32.totalorder %s1960_s9, 5  ;;  %p3069_p13 = scmp.ge.s32.totalorder %s1960_s9, 1 }
  0x27   : > { %p105_p3 = pnand %p3069_p13, %p104_p11 }
  0x29   : > { %108 = sbr.rel (%p105_p3) target bundleno = 376 (0x178), region = 24 }
  0x30   : > { %s110_s16 = sand.u32 1, %s1952_s7  }
  0x31   : > { %s1734_s17 = sshll.u32 %s110_s16, 10  ;;  %s111_s18 = scalar_lea.sflag [#allocation3], %s110_s16 }
  0x32   : > { %s2061_s19 = scalar_lea.vmem [#allocation2], %s1734_s17 }
  0x33   : > { %1943 = dma.done.wait (%p2011_p7), %s111_s18, 16384  }
  0x34   : > { %1945 = vsyncadd (%p2011_p7), %s111_s18, 4294950912  ;;  %v144_v0 = vld [vmem:[%s2061_s19 + $0x10] sm:$0xff]  ;;  %v145_v1 = vld [vmem:[%s2061_s19 + $0x18] sm:$0xff]  ;;  %s1965_s15 = smov 127   ;;  %s1735_s20 = sshll.u32 %s1725_s10, 1  ;;  %vm1557_vm0 = vcmask 55296  }
  0x35   : > { %v1739_v2 = vld [vmem:[%s2061_s19 + $0x50] sm:$0xff]  ;;  %v1740_v3 = vld [vmem:[%s2061_s19 + $0x58] sm:$0xff]  ;;  %v142_v5 = vld [vmem:[%s2061_s19] sm:$0xff]  ;;  %p136_p7 = scmp.lt.s32.totalorder %s1735_s20, 7 }
  0x36   : > { %v369_v4 = vadd.f32 %v1739_v2, %v144_v0  ;;  %v143_v6 = vld [vmem:[%s2061_s19 + $0x8] sm:$0xff]  ;;  %v370_v7 = vadd.f32 %v1740_v3, %v145_v1  ;;  %v1737_v8 = vld [vmem:[%s2061_s19 + $0x40] sm:$0xff]  ;;  %v148_v15 = vld [vmem:[%s2061_s19 + $0x30] sm:$0xff] }
  0x37   : > { %v1738_v9 = vld [vmem:[%s2061_s19 + $0x48] sm:$0xff]  ;;  %v146_v10 = vld [vmem:[%s2061_s19 + $0x20] sm:$0xff]  ;;  %v367_v11 = vadd.f32 %v1737_v8, %v142_v5  ;;  %v1743_v19 = vld [vmem:[%s2061_s19 + $0x70] sm:$0xff]  ;;  %s3125_s20 = smov (!%p136_p7, %s1735_s20), 7 }
  0x38   : > { %v368_v12 = vadd.f32 %v1738_v9, %v143_v6  ;;  %v1741_v13 = vld [vmem:[%s2061_s19 + $0x60] sm:$0xff]  ;;  %v147_v14 = vld [vmem:[%s2061_s19 + $0x28] sm:$0xff]  ;;  %v2079_v16 = vadd.f32 %v370_v7, %v369_v4  ;;  %v373_v23 = vadd.f32 %v1743_v19, %v148_v15  ;;  %v149_v27 = vld [vmem:[%s2061_s19 + $0x38] sm:$0xff]  ;;  %s1853_s9 = smul.u32 392, %s3125_s20 }
  0x39   : > { %v371_v17 = vadd.f32 %v1741_v13, %v146_v10  ;;  %v1742_v18 = vld [vmem:[%s2061_s19 + $0x68] sm:$0xff]  ;;  %v1745_v25 = vld [vmem:[%s2061_s19 + $0x80] sm:$0xff]  ;;  %v1744_v28 = vld [vmem:[%s2061_s19 + $0x78] sm:$0xff] }
  0x3a   : > { %v2083_v20 = vadd.f32 %v368_v12, %v367_v11  ;;  %679 = vrot.lane.b32.xlu1 %v2079_v16, %s1965_s15  ;;  %v372_v22 = vadd.f32 %v1742_v18, %v147_v14  ;;  %v2091_v24 = vadd.f32 %v369_v4, %v368_v12  ;;  %v1746_v26 = vld [vmem:[%s2061_s19 + $0x88] sm:$0xff]  ;;  %v375_v30 = vadd.f32 %v1745_v25, %v1737_v8  ;;  %v1747_v34 = vld [vmem:[%s2061_s19 + $0x90] sm:$0xff]  ;;  %v1748_v35 = vld [vmem:[%s2061_s19 + $0x98] sm:$0xff]  ;;  %s2432_s22 = scalar_lea.vmem %s3041_s1, %s1853_s9 }
  0x3b   : > { %v2087_v21 = vadd.f32 %v371_v17, %v370_v7  ;;  %v376_v31 = vadd.f32 %v1746_v26, %v1738_v9  ;;  %v374_v33 = vadd.f32 %v1744_v28, %v149_v27  ;;  %v377_v37 = vadd.f32 %v1747_v34, %v1739_v2  ;;  %v1749_v40 = vld [vmem:[%s2061_s19 + $0xa0] sm:$0xff]  ;;  %v1750_v41 = vld [vmem:[%s2061_s19 + $0xa8] sm:$0xff]  ;;  %v1751_v46 = vld [vmem:[%s2061_s19 + $0xb0] sm:$0xff] }
  0x3c   : > { %675 = vrot.lane.b32.xlu0 %v2083_v20, %s1965_s15  ;;  %v2099_v29 = vadd.f32 %v373_v23, %v372_v22  ;;  %v2103_v32 = vadd.f32 %v372_v22, %v371_v17  ;;  %v378_v38 = vadd.f32 %v1748_v35, %v1740_v3  ;;  %v379_v43 = vadd.f32 %v1749_v40, %v1741_v13  ;;  %v1752_v47 = vld [vmem:[%s2061_s19 + $0xb8] sm:$0xff]  ;;  %v1754_v52 = vld [vmem:[%s2061_s19 + $0xc8] sm:$0xff]  ;;  %v1755_v53 = vld [vmem:[%s2061_s19 + $0xd0] sm:$0xff] }
  0x3d   : > { %v2109_v36 = vadd.f32 %v376_v31, %v375_v30  ;;  %v2113_v39 = vadd.f32 %v374_v33, %v373_v23  ;;  %v380_v44 = vadd.f32 %v1750_v41, %v1742_v18  ;;  %v2123_v45 = vadd.f32 %v377_v37, %v376_v31  ;;  %v1753_v54 = vld [vmem:[%s2061_s19 + $0xc0] sm:$0xff]  ;;  %v1756_v60 = vld [vmem:[%s2061_s19 + $0xd8] sm:$0xff]  ;;  %v1758_v2 = vld [vmem:[%s2061_s19 + $0xe8] sm:$0xff] }
  0x3e   : > { %681 = vrot.lane.b32.xlu1 %v2087_v21, %s1965_s15  ;;  %v2119_v42 = vadd.f32 %v378_v38, %v377_v37  ;;  %v381_v49 = vadd.f32 %v1751_v46, %v1743_v19  ;;  %v382_v50 = vadd.f32 %v1752_v47, %v1744_v28  ;;  %v2133_v51 = vadd.f32 %v379_v43, %v378_v38  ;;  %v1757_v61 = vld [vmem:[%s2061_s19 + $0xe0] sm:$0xff]  ;;  %v1759_v3 = vld [vmem:[%s2061_s19 + $0xf0] sm:$0xff]  ;;  %v1762_v9 = vld [vmem:[%s2061_s19 + $0x108] sm:$0xff] }
  0x3f   : > { %v2129_v48 = vadd.f32 %v380_v44, %v379_v43  ;;  %v384_v56 = vadd.f32 %v1754_v52, %v1746_v26  ;;  %v385_v57 = vadd.f32 %v1755_v53, %v1747_v34  ;;  %v383_v59 = vadd.f32 %v1753_v54, %v1745_v25  ;;  %v1761_v8 = vld [vmem:[%s2061_s19 + $0x100] sm:$0xff]  ;;  %v1760_v10 = vld [vmem:[%s2061_s19 + $0xf8] sm:$0xff]  ;;  %v1763_v17 = vld [vmem:[%s2061_s19 + $0x110] sm:$0xff] }
  0x40   : > { %677 = vrot.lane.b32.xlu0 %v2091_v24, %s1965_s15  ;;  %v2140_v55 = vadd.f32 %v382_v50, %v381_v49  ;;  %v2144_v58 = vadd.f32 %v381_v49, %v380_v44  ;;  %v386_v63 = vadd.f32 %v1756_v60, %v1748_v35  ;;  %v387_v0 = vadd.f32 %v1757_v61, %v1749_v40  ;;  %v1764_v18 = vld [vmem:[%s2061_s19 + $0x118] sm:$0xff]  ;;  %v1765_v26 = vld [vmem:[%s2061_s19 + $0x120] sm:$0xff]  ;;  %v1766_v27 = vld [vmem:[%s2061_s19 + $0x128] sm:$0xff] }
  0x41   : > { %v2150_v62 = vadd.f32 %v385_v57, %v384_v56  ;;  %v2154_v1 = vadd.f32 %v384_v56, %v383_v59  ;;  %v388_v5 = vadd.f32 %v1758_v2, %v1750_v41  ;;  %v389_v6 = vadd.f32 %v1759_v3, %v1751_v46  ;;  %v1767_v34 = vld [vmem:[%s2061_s19 + $0x130] sm:$0xff]  ;;  %v1768_v35 = vld [vmem:[%s2061_s19 + $0x138] sm:$0xff]  ;;  %v1770_v43 = vld [vmem:[%s2061_s19 + $0x148] sm:$0xff] }
  0x42   : > { %685 = vrot.lane.b32.xlu1 %v2099_v29, %s1965_s15  ;;  %v2160_v4 = vadd.f32 %v387_v0, %v386_v63  ;;  %v2164_v7 = vadd.f32 %v386_v63, %v385_v57  ;;  %v391_v12 = vadd.f32 %v1761_v8, %v1753_v54  ;;  %v392_v13 = vadd.f32 %v1762_v9, %v1754_v52  ;;  %v1771_v44 = vld [vmem:[%s2061_s19 + $0x150] sm:$0xff]  ;;  %v1769_v46 = vld [vmem:[%s2061_s19 + $0x140] sm:$0xff]  ;;  %v1772_v54 = vld [vmem:[%s2061_s19 + $0x158] sm:$0xff] }
  0x43   : > { %v2171_v11 = vadd.f32 %v389_v6, %v388_v5  ;;  %v2175_v14 = vadd.f32 %v388_v5, %v387_v0  ;;  %v390_v15 = vadd.f32 %v1760_v10, %v1752_v47  ;;  %v393_v22 = vadd.f32 %v1763_v17, %v1755_v53  ;;  %v1773_v56 = vld [vmem:[%s2061_s19 + $0x160] sm:$0xff]  ;;  %v1774_v63 = vld [vmem:[%s2061_s19 + $0x168] sm:$0xff]  ;;  %v1775_v0 = vld [vmem:[%s2061_s19 + $0x170] sm:$0xff] }
  0x44   : > { %683 = vrot.lane.b32.xlu0 %v2103_v32, %s1965_s15  ;;  %v2181_v19 = vadd.f32 %v392_v13, %v391_v12  ;;  %v394_v23 = vadd.f32 %v1764_v18, %v1756_v60  ;;  %v395_v30 = vadd.f32 %v1765_v26, %v1757_v61  ;;  %v396_v31 = vadd.f32 %v1766_v27, %v1758_v2 }
  0x45   : > { %v2185_v25 = vadd.f32 %v390_v15, %v389_v6  ;;  %v2195_v33 = vadd.f32 %v393_v22, %v392_v13  ;;  %v397_v38 = vadd.f32 %v1767_v34, %v1759_v3  ;;  %v398_v40 = vadd.f32 %v1768_v35, %v1760_v10  ;;  %v1776_v10 = vld [vmem:[%s2061_s19 + $0x178] sm:$0xff] }
  0x46   : > { %689 = vrot.lane.b32.xlu1 %v2109_v36, %s1965_s15  ;;  %v2191_v28 = vadd.f32 %v394_v23, %v393_v22  ;;  %v2201_v37 = vadd.f32 %v396_v31, %v395_v30  ;;  %v2205_v41 = vadd.f32 %v395_v30, %v394_v23  ;;  %v400_v49 = vadd.f32 %v1770_v43, %v1762_v9  ;;  %v1778_v9 = vld [vmem:[%s2061_s19 + $0x188] sm:$0xff]  ;;  %v1779_v22 = vld [vmem:[%s2061_s19 + $0x190] sm:$0xff]  ;;  %v1780_v23 = vld [vmem:[%s2061_s19 + $0x198] sm:$0xff] }
  0x47   : > { %v2212_v47 = vadd.f32 %v398_v40, %v397_v38  ;;  %v401_v50 = vadd.f32 %v1771_v44, %v1763_v17  ;;  %v2216_v52 = vadd.f32 %v397_v38, %v396_v31  ;;  %v399_v53 = vadd.f32 %v1769_v46, %v1761_v8  ;;  %v1777_v8 = vld [vmem:[%s2061_s19 + $0x180] sm:$0xff]  ;;  %v1782_v38 = vld [vmem:[%s2061_s19 + $0x1a8] sm:$0xff] }
  0x48   : > { %687 = vrot.lane.b32.xlu0 %v2113_v39, %s1965_s15  ;;  %v402_v59 = vadd.f32 %v1772_v54, %v1764_v18  ;;  %v403_v60 = vadd.f32 %v1773_v56, %v1765_v26  ;;  %v404_v3 = vadd.f32 %v1774_v63, %v1766_v27  ;;  %v405_v5 = vadd.f32 %v1775_v0, %v1767_v34  ;;  %v1781_v34 = vld [vmem:[%s2061_s19 + $0x1a0] sm:$0xff] }
  0x49   : > { %v2222_v57 = vadd.f32 %v401_v50, %v400_v49  ;;  %v2226_v61 = vadd.f32 %v400_v49, %v399_v53  ;;  %v407_v13 = vadd.f32 %v1777_v8, %v1769_v46  ;;  %v408_v15 = vadd.f32 %v1778_v9, %v1770_v43  ;;  %v1783_v46 = vld [vmem:[%s2061_s19 + $0x1b0] sm:$0xff]  ;;  %v1784_v49 = vld [vmem:[%s2061_s19 + $0x1b8] sm:$0xff] }
  0x4a   : > { %693 = vrot.lane.b32.xlu1 %v2119_v42, %s1965_s15  ;;  %v2232_v2 = vadd.f32 %v403_v60, %v402_v59  ;;  %v2236_v6 = vadd.f32 %v402_v59, %v401_v50  ;;  %v2243_v12 = vadd.f32 %v405_v5, %v404_v3  ;;  %v2247_v17 = vadd.f32 %v404_v3, %v403_v60  ;;  %v1786_v59 = vld [vmem:[%s2061_s19 + $0x1c8] sm:$0xff]  ;;  %v1787_v60 = vld [vmem:[%s2061_s19 + $0x1d0] sm:$0xff] }
  0x4b   : > { %v406_v18 = vadd.f32 %v1776_v10, %v1768_v35  ;;  %v2253_v26 = vadd.f32 %v408_v15, %v407_v13  ;;  %v409_v27 = vadd.f32 %v1779_v22, %v1771_v44  ;;  %v410_v30 = vadd.f32 %v1780_v23, %v1772_v54 }
  0x4c   : > { %691 = vrot.lane.b32.xlu0 %v2123_v45, %s1965_s15  ;;  %v411_v40 = vadd.f32 %v1781_v34, %v1773_v56  ;;  %v412_v43 = vadd.f32 %v1782_v38, %v1774_v63  ;;  %v413_v53 = vadd.f32 %v1783_v46, %v1775_v0  ;;  %v414_v54 = vadd.f32 %v1784_v49, %v1776_v10  ;;  %v1785_v63 = vld [vmem:[%s2061_s19 + $0x1c0] sm:$0xff] }
  0x4d   : > { %v2257_v31 = vadd.f32 %v406_v18, %v405_v5  ;;  %v2263_v35 = vadd.f32 %v410_v30, %v409_v27  ;;  %v2267_v44 = vadd.f32 %v409_v27, %v408_v15  ;;  %v416_v5 = vadd.f32 %v1786_v59, %v1778_v9  ;;  %v1788_v15 = vld [vmem:[%s2061_s19 + $0x1d8] sm:$0xff]  ;;  %v1789_v18 = vld [vmem:[%s2061_s19 + $0x1e0] sm:$0xff] }
  0x4e   : > { %697 = vrot.lane.b32.xlu1 %v2129_v48, %s1965_s15  ;;  %v2273_v50 = vadd.f32 %v412_v43, %v411_v40  ;;  %v2277_v56 = vadd.f32 %v411_v40, %v410_v30  ;;  %v2284_v3 = vadd.f32 %v414_v54, %v413_v53  ;;  %v417_v13 = vadd.f32 %v1787_v60, %v1779_v22  ;;  %v1790_v40 = vld [vmem:[%s2061_s19 + $0x1e8] sm:$0xff]  ;;  %v198_v59 = vld [vmem:[%s2061_s19 + $0x200] sm:$0xff] }
  0x4f   : > { %3070 = vst [vmem:[#allocation5_spill] sm:$0xff] %v2267_v44  ;;  %v2288_v0 = vadd.f32 %v413_v53, %v412_v43  ;;  %v415_v10 = vadd.f32 %v1785_v63, %v1777_v8  ;;  %v418_v30 = vadd.f32 %v1788_v15, %v1780_v23  ;;  %v419_v9 = vadd.f32 %v1789_v18, %v1781_v34  ;;  %v1791_v8 = vld [vmem:[%s2061_s19 + $0x1f0] sm:$0xff]  ;;  %v199_v34 = vld [vmem:[%s2061_s19 + $0x208] sm:$0xff]  ;;  %v1793_v60 = vld [vmem:[%s2061_s19 + $0x240] sm:$0xff] }
  0x50   : > { %695 = vrot.lane.b32.xlu0 %v2133_v51, %s1965_s15  ;;  %3071 = vst [vmem:[#allocation6_spill] sm:$0xff] %v2273_v50  ;;  %3072 = vst [vmem:[#allocation7_spill] sm:$0xff] %v2277_v56  ;;  %v2294_v27 = vadd.f32 %v417_v13, %v416_v5  ;;  %v420_v53 = vadd.f32 %v1790_v40, %v1782_v38  ;;  %v421_v54 = vadd.f32 %v1791_v8, %v1783_v46  ;;  %v1794_v63 = vld [vmem:[%s2061_s19 + $0x248] sm:$0xff]  ;;  %v200_v15 = vld [vmem:[%s2061_s19 + $0x210] sm:$0xff] }
  0x51   : > { %3073 = vst [vmem:[#allocation8_spill] sm:$0xff] %v2284_v3  ;;  %3074 = vst [vmem:[#allocation9_spill] sm:$0xff] %v2288_v0  ;;  %v2298_v22 = vadd.f32 %v416_v5, %v415_v10  ;;  %v2304_v43 = vadd.f32 %v419_v9, %v418_v30  ;;  %v2309_v23 = vadd.f32 %v418_v30, %v417_v13  ;;  %v1792_v5 = vld [vmem:[%s2061_s19 + $0x1f8] sm:$0xff]  ;;  %v1795_v40 = vld [vmem:[%s2061_s19 + $0x250] sm:$0xff] }
  0x52   : > { %701 = vrot.lane.b32.xlu1 %v2140_v55, %s1965_s15  ;;  %3075 = vst [vmem:[#allocation10_spill] sm:$0xff] %v2294_v27  ;;  %v2317_v10 = vadd.f32 %v421_v54, %v420_v53  ;;  %v423_v38 = vadd.f32 %v1793_v60, %v198_v59  ;;  %v424_v46 = vadd.f32 %v1794_v63, %v199_v34  ;;  %v201_v30 = vld [vmem:[%s2061_s19 + $0x218] sm:$0xff] }
  0x53   : > { %3076 = vst [vmem:[#allocation11_spill] sm:$0xff] %v2298_v22  ;;  %3077 = vst [vmem:[#allocation12_spill] sm:$0xff] %v2304_v43  ;;  %v2322_v13 = vadd.f32 %v420_v53, %v419_v9  ;;  %v422_v18 = vadd.f32 %v1792_v5, %v1784_v49  ;;  %v1796_v8 = vld [vmem:[%s2061_s19 + $0x258] sm:$0xff]  ;;  %v425_v59 = vadd.f32 %v1795_v40, %v200_v15  ;;  %v203_v49 = vld [vmem:[%s2061_s19 + $0x228] sm:$0xff] }
  0x54   : > { %699 = vrot.lane.b32.xlu0 %v2144_v58, %s1965_s15  ;;  %3078 = vst [vmem:[#allocation13_spill] sm:$0xff] %v2309_v23  ;;  %3079 = vst [vmem:[#allocation14_spill] sm:$0xff] %v2317_v10  ;;  %v426_v34 = vadd.f32 %v1796_v8, %v201_v30  ;;  %v1797_v53 = vld [vmem:[%s2061_s19 + $0x260] sm:$0xff]  ;;  %v1798_v5 = vld [vmem:[%s2061_s19 + $0x268] sm:$0xff] }
  0x55   : > { %3080 = vst [vmem:[#allocation15_spill] sm:$0xff] %v2322_v13  ;;  %v2334_v9 = vadd.f32 %v422_v18, %v421_v54  ;;  %v428_v30 = vadd.f32 %v1798_v5, %v203_v49  ;;  %v205_v54 = vld [vmem:[%s2061_s19 + $0x238] sm:$0xff]  ;;  %v1799_v18 = vld [vmem:[%s2061_s19 + $0x270] sm:$0xff] }
  0x56   : > { %705 = vrot.lane.b32.xlu1 %v2150_v62, %s1965_s15 }
  0x57   : > { %3082 = vst [vmem:[#allocation17_spill] sm:$0xff] %v2334_v9 }
  0x58   : > { %703 = vrot.lane.b32.xlu0 %v2154_v1, %s1965_s15 }
  0x5a   : > { %709 = vrot.lane.b32.xlu1 %v2160_v4, %s1965_s15 }
  0x5c   : > { %707 = vrot.lane.b32.xlu0 %v2164_v7, %s1965_s15 }
  0x5e   : > { %713 = vrot.lane.b32.xlu1 %v2171_v11, %s1965_s15 }
  0x60   : > { %711 = vrot.lane.b32.xlu0 %v2175_v14, %s1965_s15 }
  0x62   : > { %717 = vrot.lane.b32.xlu1 %v2181_v19, %s1965_s15 }
  0x64   : > { %715 = vrot.lane.b32.xlu0 %v2185_v25, %s1965_s15 }
  0x66   : > { %721 = vrot.lane.b32.xlu1 %v2191_v28, %s1965_s15 }
  0x68   : > { %719 = vrot.lane.b32.xlu0 %v2195_v33, %s1965_s15 }
  0x6a   : > { %725 = vrot.lane.b32.xlu1 %v2201_v37, %s1965_s15 }
  0x6c   : > { %723 = vrot.lane.b32.xlu0 %v2205_v41, %s1965_s15 }
  0x6e   : > { %729 = vrot.lane.b32.xlu1 %v2212_v47, %s1965_s15 }
  0x70   : > { %727 = vrot.lane.b32.xlu0 %v2216_v52, %s1965_s15 }
  0x72   : > { %733 = vrot.lane.b32.xlu1 %v2222_v57, %s1965_s15 }
  0x74   : > { %731 = vrot.lane.b32.xlu0 %v2226_v61, %s1965_s15 }
  0x76   : > { %737 = vrot.lane.b32.xlu1 %v2232_v2, %s1965_s15 }
  0x78   : > { %735 = vrot.lane.b32.xlu0 %v2236_v6, %s1965_s15 }
  0x7a   : > { %741 = vrot.lane.b32.xlu1 %v2243_v12, %s1965_s15 }
  0x7c   : > { %739 = vrot.lane.b32.xlu0 %v2247_v17, %s1965_s15 }
  0x7e   : > { %745 = vrot.lane.b32.xlu1 %v2253_v26, %s1965_s15 }
  0x80   : > { %743 = vrot.lane.b32.xlu0 %v2257_v31, %s1965_s15 }
  0x82   : > { %749 = vrot.lane.b32.xlu1 %v2263_v35, %s1965_s15 }
  0x84   : > { %747 = vrot.lane.b32.xlu0 %v2267_v44, %s1965_s15 }
  0x86   : > { %753 = vrot.lane.b32.xlu1 %v2273_v50, %s1965_s15 }
  0x88   : > { %751 = vrot.lane.b32.xlu0 %v2277_v56, %s1965_s15 }
  0x8a   : > { %757 = vrot.lane.b32.xlu1 %v2284_v3, %s1965_s15 }
  0x8c   : > { %755 = vrot.lane.b32.xlu0 %v2288_v0, %s1965_s15 }
  0x8e   : > { %761 = vrot.lane.b32.xlu1 %v2294_v27, %s1965_s15 }
  0x90   : > { %759 = vrot.lane.b32.xlu0 %v2298_v22, %s1965_s15  ;;  %v202_v22 = vld [vmem:[%s2061_s19 + $0x220] sm:$0xff] }
  0x91   : > { %v427_v15 = vadd.f32 %v1797_v53, %v202_v22 }
  0x92   : > { %765 = vrot.lane.b32.xlu1 %v2304_v43, %s1965_s15  ;;  %v2329_v43 = vadd.f32 %v424_v46, %v423_v38  ;;  %v2341_v38 = vadd.f32 %v426_v34, %v425_v59 }
  0x93   : > { %v2357_v49 = vadd.f32 %v427_v15, %v426_v34  ;;  %v1804_v34 = vld [vmem:[%s2061_s19 + $0x298] sm:$0xff] }
  0x94   : > { %763 = vrot.lane.b32.xlu0 %v2309_v23, %s1965_s15  ;;  %3081 = vst [vmem:[#allocation16_spill] sm:$0xff] %v2329_v43  ;;  %3083 = vst [vmem:[#allocation18_spill] sm:$0xff] %v2341_v38  ;;  %v1800_v23 = vld [vmem:[%s2061_s19 + $0x278] sm:$0xff] }
  0x95   : > { %v430_v22 = vadd.f32 %v1800_v23, %v205_v54  ;;  %3086 = vst [vmem:[#allocation21_spill] sm:$0xff] %v2357_v49 }
  0x96   : > { %769 = vrot.lane.b32.xlu1 %v2317_v10, %s1965_s15  ;;  %v204_v10 = vld [vmem:[%s2061_s19 + $0x230] sm:$0xff] }
  0x97   : > { %v429_v27 = vadd.f32 %v1799_v18, %v204_v10 }
  0x98   : > { %767 = vrot.lane.b32.xlu0 %v2322_v13, %s1965_s15  ;;  %v2346_v13 = vadd.f32 %v425_v59, %v424_v46  ;;  %v1802_v46 = vld [vmem:[%s2061_s19 + $0x288] sm:$0xff]  ;;  %v1803_v59 = vld [vmem:[%s2061_s19 + $0x290] sm:$0xff] }
  0x99   : > { %v2364_v0 = vadd.f32 %v430_v22, %v429_v27  ;;  %v433_v3 = vadd.f32 %v1803_v59, %v1795_v40  ;;  %v2368_v10 = vadd.f32 %v429_v27, %v428_v30 }
  0x9a   : > { %773 = vrot.lane.b32.xlu1 %v2329_v43, %s1965_s15  ;;  %3084 = vst [vmem:[#allocation19_spill] sm:$0xff] %v2346_v13  ;;  %v2353_v43 = vadd.f32 %v428_v30, %v427_v15  ;;  %v1805_v15 = vld [vmem:[%s2061_s19 + $0x2a0] sm:$0xff]  ;;  %v2384_v30 = vld [vmem:[%s2061_s19 + $0x2b0] sm:$0xff] }
  0x9b   : > { %3087 = vst [vmem:[#allocation22_spill] sm:$0xff] %v2364_v0  ;;  %3088 = vst [vmem:[#allocation23_spill] sm:$0xff] %v2368_v10  ;;  %v435_v40 = vadd.f32 %v1805_v15, %v1797_v53  ;;  %v2394_v53 = vld [vmem:[%s2061_s19 + $0x2c0] sm:$0xff] }
  0x9c   : > { %771 = vrot.lane.b32.xlu0 %v2334_v9, %s1965_s15  ;;  %3085 = vst [vmem:[#allocation20_spill] sm:$0xff] %v2353_v43  ;;  %v1801_v9 = vld [vmem:[%s2061_s19 + $0x280] sm:$0xff] }
  0x9d   : > { %v431_v54 = vadd.f32 %v1801_v9, %v1793_v60  ;;  %v1806_v60 = vld [vmem:[%s2061_s19 + $0x2a8] sm:$0xff] }
  0x9e   : > { %777 = vrot.lane.b32.xlu1 %v2341_v38, %s1965_s15  ;;  %v432_v38 = vadd.f32 %v1802_v46, %v1794_v63  ;;  %v434_v63 = vadd.f32 %v1804_v34, %v1796_v8  ;;  %v437_v8 = vadd.f32 %v2384_v30, %v1799_v18 }
  0xa0   : > { %775 = vrot.lane.b32.xlu0 %v2346_v13, %s1965_s15  ;;  %v2376_v22 = vadd.f32 %v433_v3, %v432_v38  ;;  %v2380_v27 = vadd.f32 %v432_v38, %v431_v54  ;;  %v2401_v38 = vadd.f32 %v434_v63, %v433_v3 }
  0xa2   : > { %781 = vrot.lane.b32.xlu1 %v2353_v43, %s1965_s15  ;;  %3089 = vst [vmem:[#allocation24_spill] sm:$0xff] %v2376_v22  ;;  %3090 = vst [vmem:[#allocation25_spill] sm:$0xff] %v2380_v27  ;;  %v2397_v43 = vld [vmem:[%s2061_s19 + $0x2c8] sm:$0xff] }
  0xa3   : > { %v440_v18 = vadd.f32 %v2397_v43, %v1802_v46  ;;  %v2424_v46 = vld [vmem:[%s2061_s19 + $0x2d8] sm:$0xff] }
  0xa4   : > { %779 = vrot.lane.b32.xlu0 %v2357_v49, %s1965_s15  ;;  %v436_v49 = vadd.f32 %v1806_v60, %v1798_v5  ;;  %v439_v5 = vadd.f32 %v2394_v53, %v1801_v9  ;;  %v2421_v9 = vld [vmem:[%s2061_s19 + $0x2d0] sm:$0xff] }
  0xa6   : > { %785 = vrot.lane.b32.xlu1 %v2364_v0, %s1965_s15  ;;  %v2390_v0 = vadd.f32 %v435_v40, %v434_v63  ;;  %v2417_v63 = vadd.f32 %v436_v49, %v435_v40  ;;  %v2427_v44 = vadd.f32 %v440_v18, %v439_v5  ;;  %v441_v40 = vadd.f32 %v2421_v9, %v1803_v59 }
  0xa8   : > { %783 = vrot.lane.b32.xlu0 %v2368_v10, %s1965_s15  ;;  %3091 = vst [vmem:[#allocation26_spill] sm:$0xff] %v2390_v0 }
  0xaa   : > { %789 = vrot.lane.b32.xlu1 %v2376_v22, %s1965_s15  ;;  %v2404_v22 = vld [vmem:[%s2061_s19 + $0x2b8] sm:$0xff] }
  0xac   : > { %787 = vrot.lane.b32.xlu0 %v2380_v27, %s1965_s15  ;;  %v680_v54 = vpop.permute.xlu1 %679  ;;  %v2413_v27 = vadd.f32 %v437_v8, %v436_v49 }
  0xad   : > { %v971_v10 = vadd.f32 %v680_v54, %v2079_v16  ;;  %v438_v16 = vadd.f32 %v2404_v22, %v1800_v23 }
  0xae   : > { %v676_v13 = vpop.permute.xlu0 %675  ;;  %793 = vrot.lane.b32.xlu1 %v2390_v0, %s1965_s15  ;;  %3092 = vst [vmem:[#allocation27_spill] sm:$0xff] %v2413_v27 }
  0xaf   : > { %v969_v56 = vadd.f32 %v676_v13, %v2083_v20  ;;  %v1167_v3 = vrot.slane %v971_v10, 1 }
  0xb0   : > { %791 = vrot.lane.b32.xlu0 %v2401_v38, %s1965_s15  ;;  %v682_v20 = vpop.permute.xlu1 %681 }
  0xb1   : > { %v1165_v54 = vrot.slane %v969_v56, 1  ;;  %v1363_v13 = vadd.f32 %v1167_v3, %v971_v10  ;;  %v972_v0 = vadd.f32 %v682_v20, %v2087_v21  ;;  %v442_v21 = vadd.f32 %v2424_v46, %v1804_v34  ;;  %v2440_v10 = vld [vmem:[%s2061_s19 + $0x2e0] sm:$0xff] }
  0xb2   : > { %v678_v50 = vpop.permute.xlu0 %677  ;;  %797 = vrot.lane.b32.xlu1 %v2413_v27, %s1965_s15  ;;  %v2444_v20 = vadd.f32 %v438_v16, %v437_v8 }
  0xb3   : > { %v1361_v23 = vadd.f32 %v1165_v54, %v969_v56  ;;  %v970_v49 = vadd.f32 %v678_v50, %v2091_v24  ;;  %v1461_v5 = vmul.f32 0.0625, %v1363_v13  ;;  %v1168_v3 = vrot.slane %v972_v0, 1  ;;  %v2447_v56 = vld [vmem:[%s2061_s19 + $0x2e8] sm:$0xff] }
  0xb4   : > { %795 = vrot.lane.b32.xlu0 %v2417_v63, %s1965_s15  ;;  %v686_v54 = vpop.permute.xlu1 %685  ;;  %v443_v13 = vadd.f32 %v2440_v10, %v1805_v15  ;;  %v2466_v15 = vadd.f32 %v441_v40, %v440_v18 }
  0xb5   : > { %v1459_v24 = vmul.f32 0.0625, %v1361_v23  ;;  %v1166_v50 = vrot.slane %v970_v49, 1  ;;  %1560 = vst.msk [vmem:[%s2432_s22 + $0x10] sm:$0x7f] %vm1557_vm0, %v1461_v5  ;;  %v1364_v59 = vadd.f32 %v1168_v3, %v972_v0  ;;  %v974_v34 = vadd.f32 %v686_v54, %v2099_v29  ;;  %v2462_v0 = vld [vmem:[%s2061_s19 + $0x2f0] sm:$0xff] }
  0xb6   : > { %v684_v27 = vpop.permute.xlu0 %683  ;;  %801 = vrot.lane.b32.xlu1 %v2427_v44, %s1965_s15  ;;  %v2458_v23 = vadd.f32 %v442_v21, %v441_v40  ;;  %v444_v5 = vadd.f32 %v2447_v56, %v1806_v60  ;;  %3093 = vst [vmem:[#allocation28_spill] sm:$0xff] %v2466_v15 }
  0xb7   : > { %1558 = vst.msk [vmem:[%s2432_s22] sm:$0x7f] %vm1557_vm0, %v1459_v24  ;;  %v1362_v8 = vadd.f32 %v1166_v50, %v970_v49  ;;  %v973_v16 = vadd.f32 %v684_v27, %v2103_v32  ;;  %v1462_v29 = vmul.f32 0.0625, %v1364_v59  ;;  %v1170_v3 = vrot.slane %v974_v34, 1  ;;  %v2469_v49 = vld [vmem:[%s2061_s19 + $0x2f8] sm:$0xff] }
  0xb8   : > { %799 = vrot.lane.b32.xlu0 %v2444_v20, %s1965_s15  ;;  %v690_v24 = vpop.permute.xlu1 %689  ;;  %v445_v59 = vadd.f32 %v2462_v0, %v2384_v30 }
  0xb9   : > { %v1460_v32 = vmul.f32 0.0625, %v1362_v8  ;;  %v1169_v27 = vrot.slane %v973_v16, 1  ;;  %1561 = vst.msk [vmem:[%s2432_s22 + $0x18] sm:$0x7f] %vm1557_vm0, %v1462_v29  ;;  %v1366_v50 = vadd.f32 %v1170_v3, %v974_v34  ;;  %v976_v60 = vadd.f32 %v690_v24, %v2109_v36  ;;  %v2486_v36 = vld [vmem:[%s2061_s19 + $0x308] sm:$0xff]  ;;  %v2496_v24 = vld [vmem:[%s2061_s19 + $0x300] sm:$0xff] }
  0xba   : > { %v688_v54 = vpop.permute.xlu0 %687  ;;  %805 = vrot.lane.b32.xlu1 %v2458_v23, %s1965_s15  ;;  %v2481_v8 = vadd.f32 %v444_v5, %v443_v13  ;;  %v446_v34 = vadd.f32 %v2469_v49, %v2404_v22  ;;  %v2490_v3 = vadd.f32 %v443_v13, %v442_v21 }
  0xbb   : > { %1559 = vst.msk [vmem:[%s2432_s22 + $0x8] sm:$0x7f] %vm1557_vm0, %v1460_v32  ;;  %v1365_v18 = vadd.f32 %v1169_v27, %v973_v16  ;;  %v975_v40 = vadd.f32 %v688_v54, %v2113_v39  ;;  %v1464_v29 = vmul.f32 0.0625, %v1366_v50  ;;  %v1172_v30 = vrot.slane %v976_v60, 1  ;;  %v2493_v16 = vld [vmem:[%s2061_s19 + $0x310] sm:$0xff] }
  0xbc   : > { %803 = vrot.lane.b32.xlu0 %v2466_v15, %s1965_s15  ;;  %v694_v27 = vpop.permute.xlu1 %693  ;;  %v448_v15 = vadd.f32 %v2486_v36, %v2397_v43  ;;  %v2517_v43 = vadd.f32 %v445_v59, %v444_v5 }
  0xbd   : > { %v1463_v39 = vmul.f32 0.0625, %v1365_v18  ;;  %v1171_v32 = vrot.slane %v975_v40, 1  ;;  %1563 = vst.msk [vmem:[%s2432_s22 + $0x28] sm:$0x7f] %vm1557_vm0, %v1464_v29  ;;  %v1368_v22 = vadd.f32 %v1172_v30, %v976_v60  ;;  %v978_v50 = vadd.f32 %v694_v27, %v2119_v42  ;;  %v2513_v42 = vld [vmem:[%s2061_s19 + $0x318] sm:$0xff] }
  0xbe   : > { %v692_v54 = vpop.permute.xlu0 %691  ;;  %809 = vrot.lane.b32.xlu1 %v2481_v8, %s1965_s15  ;;  %v2508_v18 = vadd.f32 %v446_v34, %v445_v59  ;;  %v449_v60 = vadd.f32 %v2493_v16, %v2421_v9  ;;  %v450_v5 = vadd.f32 %v2513_v42, %v2424_v46 }
  0xbf   : > { %1562 = vst.msk [vmem:[%s2432_s22 + $0x20] sm:$0x7f] %vm1557_vm0, %v1463_v39  ;;  %v1367_v21 = vadd.f32 %v1171_v32, %v975_v40  ;;  %v977_v13 = vadd.f32 %v692_v54, %v2123_v45  ;;  %v1466_v29 = vmul.f32 0.0625, %v1368_v22  ;;  %v1174_v30 = vrot.slane %v978_v50, 1  ;;  %v2522_v40 = vld [vmem:[%s2061_s19 + $0x320] sm:$0xff] }
  0xc0   : > { %807 = vrot.lane.b32.xlu0 %v2490_v3, %s1965_s15  ;;  %v447_v45 = vadd.f32 %v2496_v24, %v2394_v53  ;;  %v698_v32 = vpop.permute.xlu1 %697  ;;  %v2534_v54 = vadd.f32 %v449_v60, %v448_v15 }
  0xc1   : > { %v1465_v34 = vmul.f32 0.0625, %v1367_v21  ;;  %v1173_v39 = vrot.slane %v977_v13, 1  ;;  %1565 = vst.msk [vmem:[%s2432_s22 + $0x38] sm:$0x7f] %vm1557_vm0, %v1466_v29  ;;  %v1370_v9 = vadd.f32 %v1174_v30, %v978_v50  ;;  %v980_v27 = vadd.f32 %v698_v32, %v2129_v48  ;;  %v2539_v48 = vld [vmem:[%s2061_s19 + $0x328] sm:$0xff] }
  0xc2   : > { %v696_v22 = vpop.permute.xlu0 %695  ;;  %813 = vrot.lane.b32.xlu1 %v2508_v18, %s1965_s15  ;;  %v451_v50 = vadd.f32 %v2522_v40, %v2440_v10  ;;  %v2543_v46 = vadd.f32 %v448_v15, %v447_v45 }
  0xc3   : > { %1564 = vst.msk [vmem:[%s2432_s22 + $0x30] sm:$0x7f] %vm1557_vm0, %v1465_v34  ;;  %v1369_v53 = vadd.f32 %v1173_v39, %v977_v13  ;;  %v979_v59 = vadd.f32 %v696_v22, %v2133_v51  ;;  %v1468_v21 = vmul.f32 0.0625, %v1370_v9  ;;  %v1176_v29 = vrot.slane %v980_v27, 1  ;;  %v2546_v51 = vld [vmem:[%s2061_s19 + $0x330] sm:$0xff] }
  0xc4   : > { %811 = vrot.lane.b32.xlu0 %v2517_v43, %s1965_s15  ;;  %v702_v34 = vpop.permute.xlu1 %701  ;;  %v452_v9 = vadd.f32 %v2539_v48, %v2447_v56  ;;  %v2558_v22 = vadd.f32 %v451_v50, %v450_v5 }
  0xc5   : > { %v1467_v13 = vmul.f32 0.0625, %v1369_v53  ;;  %v1175_v30 = vrot.slane %v979_v59, 1  ;;  %1567 = vst.msk [vmem:[%s2432_s22 + $0x48] sm:$0x7f] %vm1557_vm0, %v1468_v21  ;;  %v1372_v39 = vadd.f32 %v1176_v29, %v980_v27  ;;  %v982_v10 = vadd.f32 %v702_v34, %v2140_v55  ;;  %v2563_v55 = vld [vmem:[%s2061_s19 + $0x340] sm:$0xff]  ;;  %v2566_v53 = vld [vmem:[%s2061_s19 + $0x348] sm:$0xff] }
  0xc6   : > { %v700_v32 = vpop.permute.xlu0 %699  ;;  %817 = vrot.lane.b32.xlu1 %v2534_v54, %s1965_s15  ;;  %v453_v27 = vadd.f32 %v2546_v51, %v2462_v0 }
  0xc7   : > { %1566 = vst.msk [vmem:[%s2432_s22 + $0x40] sm:$0x7f] %vm1557_vm0, %v1467_v13  ;;  %v1371_v15 = vadd.f32 %v1175_v30, %v979_v59  ;;  %v981_v45 = vadd.f32 %v700_v32, %v2144_v58  ;;  %v1470_v56 = vmul.f32 0.0625, %v1372_v39  ;;  %v1178_v21 = vrot.slane %v982_v10, 1  ;;  %v2573_v30 = vld [vmem:[%s2061_s19 + $0x338] sm:$0xff] }
  0xc8   : > { %815 = vrot.lane.b32.xlu0 %v2543_v46, %s1965_s15  ;;  %v2570_v59 = vadd.f32 %v450_v5, %v449_v60  ;;  %v706_v13 = vpop.permute.xlu1 %705  ;;  %v455_v39 = vadd.f32 %v2563_v55, %v2496_v24  ;;  %v456_v60 = vadd.f32 %v2566_v53, %v2486_v36  ;;  %v2591_v24 = vadd.f32 %v452_v9, %v451_v50 }
  0xc9   : > { %v1469_v58 = vmul.f32 0.0625, %v1371_v15  ;;  %v1177_v29 = vrot.slane %v981_v45, 1  ;;  %1569 = vst.msk [vmem:[%s2432_s22 + $0x58] sm:$0x7f] %vm1557_vm0, %v1470_v56  ;;  %v1374_v0 = vadd.f32 %v1178_v21, %v982_v10  ;;  %v984_v34 = vadd.f32 %v706_v13, %v2150_v62  ;;  %v2596_v21 = vld [vmem:[%s2061_s19 + $0x350] sm:$0xff] }
  0xca   : > { %v704_v32 = vpop.permute.xlu0 %703  ;;  %821 = vrot.lane.b32.xlu1 %v2558_v22, %s1965_s15  ;;  %v2587_v10 = vadd.f32 %v453_v27, %v452_v9  ;;  %v454_v36 = vadd.f32 %v2573_v30, %v2469_v49  ;;  %v2604_v50 = vadd.f32 %v456_v60, %v455_v39 }
  0xcb   : > { %1568 = vst.msk [vmem:[%s2432_s22 + $0x50] sm:$0x7f] %vm1557_vm0, %v1469_v58  ;;  %v1373_v5 = vadd.f32 %v1177_v29, %v981_v45  ;;  %v983_v15 = vadd.f32 %v704_v32, %v2154_v1  ;;  %v1472_v62 = vmul.f32 0.0625, %v1374_v0  ;;  %v1180_v56 = vrot.slane %v984_v34, 1  ;;  %v2599_v1 = vld [vmem:[%s2061_s19 + $0x358] sm:$0xff] }
  0xcc   : > { %819 = vrot.lane.b32.xlu0 %v2570_v59, %s1965_s15  ;;  %v710_v29 = vpop.permute.xlu1 %709 }
  0xcd   : > { %v1471_v45 = vmul.f32 0.0625, %v1373_v5  ;;  %v1179_v58 = vrot.slane %v983_v15, 1  ;;  %1571 = vst.msk [vmem:[%s2432_s22 + $0x68] sm:$0x7f] %vm1557_vm0, %v1472_v62  ;;  %v1376_v13 = vadd.f32 %v1180_v56, %v984_v34  ;;  %v986_v0 = vadd.f32 %v710_v29, %v2160_v4  ;;  %v2616_v4 = vld [vmem:[%s2061_s19 + $0x360] sm:$0xff] }
  0xce   : > { %v708_v32 = vpop.permute.xlu0 %707  ;;  %825 = vrot.lane.b32.xlu1 %v2587_v10, %s1965_s15  ;;  %v457_v5 = vadd.f32 %v2596_v21, %v2493_v16  ;;  %v458_v34 = vadd.f32 %v2599_v1, %v2513_v42 }
  0xcf   : > { %1570 = vst.msk [vmem:[%s2432_s22 + $0x60] sm:$0x7f] %vm1557_vm0, %v1471_v45  ;;  %v1375_v49 = vadd.f32 %v1179_v58, %v983_v15  ;;  %v985_v9 = vadd.f32 %v708_v32, %v2164_v7  ;;  %v1474_v39 = vmul.f32 0.0625, %v1376_v13  ;;  %v1182_v62 = vrot.slane %v986_v0, 1  ;;  %v2623_v7 = vld [vmem:[%s2061_s19 + $0x368] sm:$0xff] }
  0xd0   : > { %823 = vrot.lane.b32.xlu0 %v2591_v24, %s1965_s15  ;;  %v2620_v15 = vadd.f32 %v454_v36, %v453_v27  ;;  %v714_v58 = vpop.permute.xlu1 %713  ;;  %v459_v13 = vadd.f32 %v2616_v4, %v2522_v40  ;;  %v2635_v32 = vadd.f32 %v458_v34, %v457_v5  ;;  %v2644_v40 = vadd.f32 %v457_v5, %v456_v60 }
  0xd1   : > { %v1473_v56 = vmul.f32 0.0625, %v1375_v49  ;;  %v1181_v45 = vrot.slane %v985_v9, 1  ;;  %1573 = vst.msk [vmem:[%s2432_s22 + $0x78] sm:$0x7f] %vm1557_vm0, %v1474_v39  ;;  %v1378_v16 = vadd.f32 %v1182_v62, %v986_v0  ;;  %v988_v42 = vadd.f32 %v714_v58, %v2171_v11  ;;  %v2640_v11 = vld [vmem:[%s2061_s19 + $0x370] sm:$0xff] }
  0xd2   : > { %v712_v29 = vpop.permute.xlu0 %711  ;;  %829 = vrot.lane.b32.xlu1 %v2604_v50, %s1965_s15  ;;  %v460_v0 = vadd.f32 %v2623_v7, %v2539_v48 }
  0xd3   : > { %1572 = vst.msk [vmem:[%s2432_s22 + $0x70] sm:$0x7f] %vm1557_vm0, %v1473_v56  ;;  %v1377_v27 = vadd.f32 %v1181_v45, %v985_v9  ;;  %v987_v36 = vadd.f32 %v712_v29, %v2175_v14  ;;  %v1476_v49 = vmul.f32 0.0625, %v1378_v16  ;;  %v1184_v39 = vrot.slane %v988_v42, 1  ;;  %v2647_v14 = vld [vmem:[%s2061_s19 + $0x378] sm:$0xff] }
  0xd4   : > { %827 = vrot.lane.b32.xlu0 %v2620_v15, %s1965_s15  ;;  %v718_v56 = vpop.permute.xlu1 %717  ;;  %v461_v16 = vadd.f32 %v2640_v11, %v2546_v51  ;;  %v2659_v29 = vadd.f32 %v460_v0, %v459_v13 }
  0xd5   : > { %v1475_v9 = vmul.f32 0.0625, %v1377_v27  ;;  %v1183_v62 = vrot.slane %v987_v36, 1  ;;  %1575 = vst.msk [vmem:[%s2432_s22 + $0x88] sm:$0x7f] %vm1557_vm0, %v1476_v49  ;;  %v1380_v45 = vadd.f32 %v1184_v39, %v988_v42  ;;  %v990_v48 = vadd.f32 %v718_v56, %v2181_v19  ;;  %v2664_v19 = vld [vmem:[%s2061_s19 + $0x388] sm:$0xff] }
  0xd6   : > { %v716_v58 = vpop.permute.xlu0 %715  ;;  %833 = vrot.lane.b32.xlu1 %v2635_v32, %s1965_s15  ;;  %v462_v42 = vadd.f32 %v2647_v14, %v2573_v30  ;;  %v2668_v49 = vadd.f32 %v459_v13, %v458_v34 }
  0xd7   : > { %1574 = vst.msk [vmem:[%s2432_s22 + $0x80] sm:$0x7f] %vm1557_vm0, %v1475_v9  ;;  %v1379_v60 = vadd.f32 %v1183_v62, %v987_v36  ;;  %v989_v5 = vadd.f32 %v716_v58, %v2185_v25  ;;  %v1478_v27 = vmul.f32 0.0625, %v1380_v45  ;;  %v1186_v51 = vrot.slane %v990_v48, 1  ;;  %v2671_v36 = vld [vmem:[%s2061_s19 + $0x390] sm:$0xff]  ;;  %v2674_v62 = vld [vmem:[%s2061_s19 + $0x380] sm:$0xff] }
  0xd8   : > { %831 = vrot.lane.b32.xlu0 %v2644_v40, %s1965_s15  ;;  %v722_v9 = vpop.permute.xlu1 %721  ;;  %v464_v58 = vadd.f32 %v2664_v19, %v2566_v53 }
  0xd9   : > { %v1477_v25 = vmul.f32 0.0625, %v1379_v60  ;;  %v1185_v39 = vrot.slane %v989_v5, 1  ;;  %1577 = vst.msk [vmem:[%s2432_s22 + $0x98] sm:$0x7f] %vm1557_vm0, %v1478_v27  ;;  %v1382_v30 = vadd.f32 %v1186_v51, %v990_v48  ;;  %v992_v56 = vadd.f32 %v722_v9, %v2191_v28  ;;  %v2691_v27 = vld [vmem:[%s2061_s19 + $0x398] sm:$0xff]  ;;  %v2694_v28 = vld [vmem:[%s2061_s19 + $0x3a0] sm:$0xff] }
  0xda   : > { %v720_v45 = vpop.permute.xlu0 %719  ;;  %837 = vrot.lane.b32.xlu1 %v2659_v29, %s1965_s15  ;;  %v2686_v60 = vadd.f32 %v462_v42, %v461_v16  ;;  %v465_v48 = vadd.f32 %v2671_v36, %v2596_v21 }
  0xdb   : > { %1576 = vst.msk [vmem:[%s2432_s22 + $0x90] sm:$0x7f] %vm1557_vm0, %v1477_v25  ;;  %v1381_v34 = vadd.f32 %v1185_v39, %v989_v5  ;;  %v991_v13 = vadd.f32 %v720_v45, %v2195_v33  ;;  %v1480_v53 = vmul.f32 0.0625, %v1382_v30  ;;  %v1188_v51 = vrot.slane %v992_v56, 1 }
  0xdc   : > { %835 = vrot.lane.b32.xlu0 %v2668_v49, %s1965_s15  ;;  %v2698_v5 = vadd.f32 %v461_v16, %v460_v0  ;;  %v463_v33 = vadd.f32 %v2674_v62, %v2563_v55  ;;  %v726_v39 = vpop.permute.xlu1 %725  ;;  %v466_v45 = vadd.f32 %v2691_v27, %v2599_v1  ;;  %v467_v0 = vadd.f32 %v2694_v28, %v2616_v4  ;;  %v2724_v4 = vld [vmem:[%s2061_s19 + $0x3b0] sm:$0xff] }
  0xdd   : > { %v1479_v42 = vmul.f32 0.0625, %v1381_v34  ;;  %v1187_v25 = vrot.slane %v991_v13, 1  ;;  %1579 = vst.msk [vmem:[%s2432_s22 + $0xa8] sm:$0x7f] %vm1557_vm0, %v1480_v53  ;;  %v1384_v21 = vadd.f32 %v1188_v51, %v992_v56  ;;  %v994_v9 = vadd.f32 %v726_v39, %v2201_v37  ;;  %v2721_v53 = vld [vmem:[%s2061_s19 + $0x3a8] sm:$0xff] }
  0xde   : > { %v724_v30 = vpop.permute.xlu0 %723  ;;  %841 = vrot.lane.b32.xlu1 %v2686_v60, %s1965_s15  ;;  %v2714_v56 = vadd.f32 %v465_v48, %v464_v58  ;;  %v2718_v1 = vadd.f32 %v464_v58, %v463_v33 }
  0xdf   : > { %1578 = vst.msk [vmem:[%s2432_s22 + $0xa0] sm:$0x7f] %vm1557_vm0, %v1479_v42  ;;  %v1383_v55 = vadd.f32 %v1187_v25, %v991_v13  ;;  %v993_v16 = vadd.f32 %v724_v30, %v2205_v41  ;;  %v1482_v37 = vmul.f32 0.0625, %v1384_v21  ;;  %v1190_v34 = vrot.slane %v994_v9, 1 }
  0xe0   : > { %3094 = vst [vmem:[#allocation29_spill] sm:$0xff] %v2714_v56  ;;  %839 = vrot.lane.b32.xlu0 %v2698_v5, %s1965_s15  ;;  %v730_v51 = vpop.permute.xlu1 %729  ;;  %v2729_v21 = vadd.f32 %v467_v0, %v466_v45  ;;  %v468_v30 = vadd.f32 %v2721_v53, %v2623_v7 }
  0xe1   : > { %v1481_v41 = vmul.f32 0.0625, %v1383_v55  ;;  %v1189_v13 = vrot.slane %v993_v16, 1  ;;  %1581 = vst.msk [vmem:[%s2432_s22 + $0xb8] sm:$0x7f] %vm1557_vm0, %v1482_v37  ;;  %v1386_v42 = vadd.f32 %v1190_v34, %v994_v9  ;;  %v996_v25 = vadd.f32 %v730_v51, %v2212_v47  ;;  %v1841_v47 = vld [vmem:[%s2061_s19 + $0x3c0] sm:$0xff]  ;;  %v1842_v55 = vld [vmem:[%s2061_s19 + $0x3c8] sm:$0xff] }
  0xe2   : > { %v728_v39 = vpop.permute.xlu0 %727  ;;  %845 = vrot.lane.b32.xlu1 %v2714_v56, %s1965_s15  ;;  %v469_v9 = vadd.f32 %v2724_v4, %v2640_v11  ;;  %v2747_v51 = vld [vmem:[%s2061_s19 + $0x3b8] sm:$0xff]  ;;  %v472_v56 = vadd.f32 %v1842_v55, %v2664_v19 }
  0xe3   : > { %1580 = vst.msk [vmem:[%s2432_s22 + $0xb0] sm:$0x7f] %vm1557_vm0, %v1481_v41  ;;  %v1385_v58 = vadd.f32 %v1189_v13, %v993_v16  ;;  %v995_v33 = vadd.f32 %v728_v39, %v2216_v52  ;;  %v1484_v37 = vmul.f32 0.0625, %v1386_v42  ;;  %v1192_v34 = vrot.slane %v996_v25, 1 }
  0xe4   : > { %843 = vrot.lane.b32.xlu0 %v2718_v1, %s1965_s15  ;;  %v2744_v16 = vadd.f32 %v466_v45, %v465_v48  ;;  %v734_v13 = vpop.permute.xlu1 %733  ;;  %v471_v42 = vadd.f32 %v1841_v47, %v2674_v62  ;;  %v470_v19 = vadd.f32 %v2747_v51, %v2647_v14  ;;  %v1843_v62 = vld [vmem:[%s2061_s19 + $0x3d0] sm:$0xff] }
  0xe5   : > { %v1483_v52 = vmul.f32 0.0625, %v1385_v58  ;;  %v1191_v41 = vrot.slane %v995_v33, 1  ;;  %1583 = vst.msk [vmem:[%s2432_s22 + $0xc8] sm:$0x7f] %vm1557_vm0, %v1484_v37  ;;  %v1388_v7 = vadd.f32 %v1192_v34, %v996_v25  ;;  %v998_v11 = vadd.f32 %v734_v13, %v2222_v57 }
  0xe6   : > { %v732_v39 = vpop.permute.xlu0 %731  ;;  %849 = vrot.lane.b32.xlu1 %v2729_v21, %s1965_s15  ;;  %v2759_v58 = vadd.f32 %v469_v9, %v468_v30  ;;  %v2763_v57 = vadd.f32 %v468_v30, %v467_v0  ;;  %v2772_v13 = vadd.f32 %v472_v56, %v471_v42  ;;  %v473_v30 = vadd.f32 %v1843_v62, %v2671_v36 }
  0xe7   : > { %1582 = vst.msk [vmem:[%s2432_s22 + $0xc0] sm:$0x7f] %vm1557_vm0, %v1483_v52  ;;  %v1387_v48 = vadd.f32 %v1191_v41, %v995_v33  ;;  %v997_v45 = vadd.f32 %v732_v39, %v2226_v61  ;;  %v1486_v25 = vmul.f32 0.0625, %v1388_v7  ;;  %v1194_v37 = vrot.slane %v998_v11, 1  ;;  %v1844_v33 = vld [vmem:[%s2061_s19 + $0x3d8] sm:$0xff]  ;;  %v1846_v39 = vld [vmem:[%s2061_s19 + $0x3e8] sm:$0xff] }
  0xe8   : > { %847 = vrot.lane.b32.xlu0 %v2744_v16, %s1965_s15  ;;  %v738_v55 = vpop.permute.xlu1 %737  ;;  %v474_v7 = vadd.f32 %v1844_v33, %v2691_v27  ;;  %v2785_v42 = vadd.f32 %v470_v19, %v469_v9  ;;  %v476_v33 = vadd.f32 %v1846_v39, %v2721_v53  ;;  %v1848_v53 = vld [vmem:[%s2061_s19 + $0x3f8] sm:$0xff] }
  0xe9   : > { %v1485_v61 = vmul.f32 0.0625, %v1387_v48  ;;  %v1193_v47 = vrot.slane %v997_v45, 1  ;;  %1585 = vst.msk [vmem:[%s2432_s22 + $0xd8] sm:$0x7f] %vm1557_vm0, %v1486_v25  ;;  %v1390_v34 = vadd.f32 %v1194_v37, %v998_v11  ;;  %v1000_v52 = vadd.f32 %v738_v55, %v2232_v2  ;;  %v1845_v11 = vld [vmem:[%s2061_s19 + $0x3e0] sm:$0xff] }
  0xea   : > { %v736_v41 = vpop.permute.xlu0 %735  ;;  %853 = vrot.lane.b32.xlu1 %v2759_v58, %s1965_s15  ;;  %v475_v62 = vadd.f32 %v1845_v11, %v2694_v28  ;;  %v1847_v28 = vld [vmem:[%s2061_s19 + $0x3f0] sm:$0xff] }
  0xeb   : > { %1584 = vst.msk [vmem:[%s2432_s22 + $0xd0] sm:$0x7f] %vm1557_vm0, %v1485_v61  ;;  %v1389_v0 = vadd.f32 %v1193_v47, %v997_v45  ;;  %v999_v14 = vadd.f32 %v736_v41, %v2236_v6  ;;  %v1488_v2 = vmul.f32 0.0625, %v1390_v34  ;;  %v1196_v48 = vrot.slane %v1000_v52, 1 }
  0xec   : > { %851 = vrot.lane.b32.xlu0 %v2763_v57, %s1965_s15  ;;  %v742_v6 = vpop.permute.xlu1 %741  ;;  %v2797_v61 = vadd.f32 %v474_v7, %v473_v30  ;;  %v2808_v11 = vadd.f32 %v476_v33, %v475_v62 }
  0xed   : > { %v1487_v45 = vmul.f32 0.0625, %v1389_v0  ;;  %v1195_v25 = vrot.slane %v999_v14, 1  ;;  %1587 = vst.msk [vmem:[%s2432_s22 + $0xe8] sm:$0x7f] %vm1557_vm0, %v1488_v2  ;;  %v1392_v36 = vadd.f32 %v1196_v48, %v1000_v52  ;;  %v1002_v27 = vadd.f32 %v742_v6, %v2243_v12 }
  0xee   : > { %v740_v37 = vpop.permute.xlu0 %739  ;;  %857 = vrot.lane.b32.xlu1 %v2772_v13, %s1965_s15  ;;  %v2801_v12 = vadd.f32 %v473_v30, %v472_v56  ;;  %v477_v30 = vadd.f32 %v1847_v28, %v2724_v4  ;;  %v478_v2 = vadd.f32 %v1848_v53, %v2747_v51  ;;  %v3095_v51 = vld [vmem:[#allocation5_spill] sm:$0xff] }
  0xef   : > { %1586 = vst.msk [vmem:[%s2432_s22 + $0xe0] sm:$0x7f] %vm1557_vm0, %v1487_v45  ;;  %v1391_v9 = vadd.f32 %v1195_v25, %v999_v14  ;;  %v1001_v19 = vadd.f32 %v740_v37, %v2247_v17  ;;  %v1490_v47 = vmul.f32 0.0625, %v1392_v36  ;;  %v1198_v55 = vrot.slane %v1002_v27, 1 }
  0xf0   : > { %855 = vrot.lane.b32.xlu0 %v2785_v42, %s1965_s15  ;;  %v746_v41 = vpop.permute.xlu1 %745 }
  0xf1   : > { %v1489_v34 = vmul.f32 0.0625, %v1391_v9  ;;  %v1197_v52 = vrot.slane %v1001_v19, 1  ;;  %1589 = vst.msk [vmem:[%s2432_s22 + $0xf8] sm:$0x7f] %vm1557_vm0, %v1490_v47  ;;  %v1394_v17 = vadd.f32 %v1198_v55, %v1002_v27  ;;  %v1004_v0 = vadd.f32 %v746_v41, %v2253_v26 }
  0xf2   : > { %v744_v14 = vpop.permute.xlu0 %743  ;;  %861 = vrot.lane.b32.xlu1 %v2797_v61, %s1965_s15  ;;  %v2819_v26 = vadd.f32 %v475_v62, %v474_v7  ;;  %v2829_v7 = vadd.f32 %v478_v2, %v477_v30  ;;  %v2833_v47 = vadd.f32 %v477_v30, %v476_v33 }
  0xf3   : > { %1588 = vst.msk [vmem:[%s2432_s22 + $0xf0] sm:$0x7f] %vm1557_vm0, %v1489_v34  ;;  %v1393_v39 = vadd.f32 %v1197_v52, %v1001_v19  ;;  %v1003_v56 = vadd.f32 %v744_v14, %v2257_v31  ;;  %v1492_v48 = vmul.f32 0.0625, %v1394_v17  ;;  %v1200_v45 = vrot.slane %v1004_v0, 1  ;;  %v3096_v34 = vld [vmem:[#allocation6_spill] sm:$0xff] }
  0xf4   : > { %859 = vrot.lane.b32.xlu0 %v2801_v12, %s1965_s15  ;;  %v750_v36 = vpop.permute.xlu1 %749 }
  0xf5   : > { %v1491_v25 = vmul.f32 0.0625, %v1393_v39  ;;  %v1199_v6 = vrot.slane %v1003_v56, 1  ;;  %1591 = vst.msk [vmem:[%s2432_s22 + $0x108] sm:$0x7f] %vm1557_vm0, %v1492_v48  ;;  %v1396_v31 = vadd.f32 %v1200_v45, %v1004_v0  ;;  %v1006_v27 = vadd.f32 %v750_v36, %v2263_v35  ;;  %v3097_v0 = vld [vmem:[#allocation7_spill] sm:$0xff]  ;;  %v3098_v45 = vld [vmem:[#allocation8_spill] sm:$0xff] }
  0xf6   : > { %v748_v37 = vpop.permute.xlu0 %747  ;;  %865 = vrot.lane.b32.xlu1 %v2808_v11, %s1965_s15 }
  0xf7   : > { %1590 = vst.msk [vmem:[%s2432_s22 + $0x100] sm:$0x7f] %vm1557_vm0, %v1491_v25  ;;  %v1395_v4 = vadd.f32 %v1199_v6, %v1003_v56  ;;  %v1005_v9 = vadd.f32 %v748_v37, %v3095_v51  ;;  %v1494_v62 = vmul.f32 0.0625, %v1396_v31  ;;  %v1202_v19 = vrot.slane %v1006_v27, 1  ;;  %v3099_v31 = vld [vmem:[#allocation9_spill] sm:$0xff] }
  0xf8   : > { %863 = vrot.lane.b32.xlu0 %v2819_v26, %s1965_s15  ;;  %v754_v28 = vpop.permute.xlu1 %753 }
  0xf9   : > { %v1493_v35 = vmul.f32 0.0625, %v1395_v4  ;;  %v1201_v55 = vrot.slane %v1005_v9, 1  ;;  %1593 = vst.msk [vmem:[%s2432_s22 + $0x118] sm:$0x7f] %vm1557_vm0, %v1494_v62  ;;  %v1398_v53 = vadd.f32 %v1202_v19, %v1006_v27  ;;  %v1008_v52 = vadd.f32 %v754_v28, %v3096_v34  ;;  %v3101_v34 = vld [vmem:[#allocation11_spill] sm:$0xff] }
  0xfa   : > { %v752_v41 = vpop.permute.xlu0 %751  ;;  %869 = vrot.lane.b32.xlu1 %v2829_v7, %s1965_s15 }
  0xfb   : > { %1592 = vst.msk [vmem:[%s2432_s22 + $0x110] sm:$0x7f] %vm1557_vm0, %v1493_v35  ;;  %v1397_v17 = vadd.f32 %v1201_v55, %v1005_v9  ;;  %v1007_v14 = vadd.f32 %v752_v41, %v3097_v0  ;;  %v1496_v33 = vmul.f32 0.0625, %v1398_v53  ;;  %v1204_v39 = vrot.slane %v1008_v52, 1  ;;  %v3100_v35 = vld [vmem:[#allocation10_spill] sm:$0xff] }
  0xfc   : > { %867 = vrot.lane.b32.xlu0 %v2833_v47, %s1965_s15  ;;  %v758_v2 = vpop.permute.xlu1 %757 }
  0xfd   : > { %v1495_v56 = vmul.f32 0.0625, %v1397_v17  ;;  %v1203_v30 = vrot.slane %v1007_v14, 1  ;;  %1595 = vst.msk [vmem:[%s2432_s22 + $0x128] sm:$0x7f] %vm1557_vm0, %v1496_v33  ;;  %v1400_v48 = vadd.f32 %v1204_v39, %v1008_v52  ;;  %v1010_v25 = vadd.f32 %v758_v2, %v3098_v45  ;;  %v3103_v45 = vld [vmem:[#allocation13_spill] sm:$0xff] }
  0xfe   : > { %v756_v6 = vpop.permute.xlu0 %755 }
  0xff   : > { %1594 = vst.msk [vmem:[%s2432_s22 + $0x120] sm:$0x7f] %vm1557_vm0, %v1495_v56  ;;  %v1399_v36 = vadd.f32 %v1203_v30, %v1007_v14  ;;  %v1009_v27 = vadd.f32 %v756_v6, %v3099_v31  ;;  %v1498_v37 = vmul.f32 0.0625, %v1400_v48  ;;  %v1206_v4 = vrot.slane %v1010_v25, 1  ;;  %v3102_v56 = vld [vmem:[#allocation12_spill] sm:$0xff] }
 0x100   : > { %v762_v62 = vpop.permute.xlu1 %761 }
 0x101   : > { %v1497_v51 = vmul.f32 0.0625, %v1399_v36  ;;  %v1205_v9 = vrot.slane %v1009_v27, 1  ;;  %1597 = vst.msk [vmem:[%s2432_s22 + $0x138] sm:$0x7f] %vm1557_vm0, %v1498_v37  ;;  %v1402_v19 = vadd.f32 %v1206_v4, %v1010_v25  ;;  %v1012_v55 = vadd.f32 %v762_v62, %v3100_v35  ;;  %v3105_v35 = vld [vmem:[#allocation15_spill] sm:$0xff] }
 0x102   : > { %v760_v28 = vpop.permute.xlu0 %759 }
 0x103   : > { %1596 = vst.msk [vmem:[%s2432_s22 + $0x130] sm:$0x7f] %vm1557_vm0, %v1497_v51  ;;  %v1401_v53 = vadd.f32 %v1205_v9, %v1009_v27  ;;  %v1011_v52 = vadd.f32 %v760_v28, %v3101_v34  ;;  %v1500_v41 = vmul.f32 0.0625, %v1402_v19  ;;  %v1208_v17 = vrot.slane %v1012_v55, 1  ;;  %v3104_v51 = vld [vmem:[#allocation14_spill] sm:$0xff] }
 0x104   : > { %v766_v33 = vpop.permute.xlu1 %765 }
 0x105   : > { %v1499_v0 = vmul.f32 0.0625, %v1401_v53  ;;  %v1207_v14 = vrot.slane %v1011_v52, 1  ;;  %1599 = vst.msk [vmem:[%s2432_s22 + $0x148] sm:$0x7f] %vm1557_vm0, %v1500_v41  ;;  %v1404_v39 = vadd.f32 %v1208_v17, %v1012_v55  ;;  %v1014_v30 = vadd.f32 %v766_v33, %v3102_v56  ;;  %v3107_v56 = vld [vmem:[#allocation17_spill] sm:$0xff] }
 0x106   : > { %v764_v2 = vpop.permute.xlu0 %763 }
 0x107   : > { %1598 = vst.msk [vmem:[%s2432_s22 + $0x140] sm:$0x7f] %vm1557_vm0, %v1499_v0  ;;  %v1403_v48 = vadd.f32 %v1207_v14, %v1011_v52  ;;  %v1013_v25 = vadd.f32 %v764_v2, %v3103_v45  ;;  %v1502_v6 = vmul.f32 0.0625, %v1404_v39  ;;  %v1210_v36 = vrot.slane %v1014_v30, 1  ;;  %v3106_v0 = vld [vmem:[#allocation16_spill] sm:$0xff] }
 0x108   : > { %v770_v37 = vpop.permute.xlu1 %769 }
 0x109   : > { %v1501_v31 = vmul.f32 0.0625, %v1403_v48  ;;  %v1209_v27 = vrot.slane %v1013_v25, 1  ;;  %1601 = vst.msk [vmem:[%s2432_s22 + $0x158] sm:$0x7f] %vm1557_vm0, %v1502_v6  ;;  %v1406_v4 = vadd.f32 %v1210_v36, %v1014_v30  ;;  %v1016_v9 = vadd.f32 %v770_v37, %v3104_v51  ;;  %v3109_v51 = vld [vmem:[#allocation19_spill] sm:$0xff] }
 0x10a   : > { %v768_v62 = vpop.permute.xlu0 %767 }
 0x10b   : > { %1600 = vst.msk [vmem:[%s2432_s22 + $0x150] sm:$0x7f] %vm1557_vm0, %v1501_v31  ;;  %v1405_v19 = vadd.f32 %v1209_v27, %v1013_v25  ;;  %v1015_v55 = vadd.f32 %v768_v62, %v3105_v35  ;;  %v1504_v28 = vmul.f32 0.0625, %v1406_v4  ;;  %v1212_v53 = vrot.slane %v1016_v9, 1  ;;  %v3108_v31 = vld [vmem:[#allocation18_spill] sm:$0xff] }
 0x10c   : > { %v774_v41 = vpop.permute.xlu1 %773 }
 0x10d   : > { %v1503_v34 = vmul.f32 0.0625, %v1405_v19  ;;  %v1211_v52 = vrot.slane %v1015_v55, 1  ;;  %1603 = vst.msk [vmem:[%s2432_s22 + $0x168] sm:$0x7f] %vm1557_vm0, %v1504_v28  ;;  %v1408_v17 = vadd.f32 %v1212_v53, %v1016_v9  ;;  %v1018_v14 = vadd.f32 %v774_v41, %v3106_v0  ;;  %v3111_v0 = vld [vmem:[#allocation21_spill] sm:$0xff] }
 0x10e   : > { %v772_v33 = vpop.permute.xlu0 %771 }
 0x10f   : > { %1602 = vst.msk [vmem:[%s2432_s22 + $0x160] sm:$0x7f] %vm1557_vm0, %v1503_v34  ;;  %v1407_v39 = vadd.f32 %v1211_v52, %v1015_v55  ;;  %v1017_v30 = vadd.f32 %v772_v33, %v3107_v56  ;;  %v1506_v2 = vmul.f32 0.0625, %v1408_v17  ;;  %v1214_v48 = vrot.slane %v1018_v14, 1  ;;  %v3110_v34 = vld [vmem:[#allocation20_spill] sm:$0xff] }
 0x110   : > { %v778_v6 = vpop.permute.xlu1 %777 }
 0x111   : > { %v1505_v45 = vmul.f32 0.0625, %v1407_v39  ;;  %v1213_v25 = vrot.slane %v1017_v30, 1  ;;  %1605 = vst.msk [vmem:[%s2432_s22 + $0x178] sm:$0x7f] %vm1557_vm0, %v1506_v2  ;;  %v1410_v36 = vadd.f32 %v1214_v48, %v1018_v14  ;;  %v1020_v27 = vadd.f32 %v778_v6, %v3108_v31  ;;  %v3113_v31 = vld [vmem:[#allocation23_spill] sm:$0xff] }
 0x112   : > { %v776_v37 = vpop.permute.xlu0 %775 }
 0x113   : > { %1604 = vst.msk [vmem:[%s2432_s22 + $0x170] sm:$0x7f] %vm1557_vm0, %v1505_v45  ;;  %v1409_v4 = vadd.f32 %v1213_v25, %v1017_v30  ;;  %v1019_v9 = vadd.f32 %v776_v37, %v3109_v51  ;;  %v1508_v62 = vmul.f32 0.0625, %v1410_v36  ;;  %v1216_v19 = vrot.slane %v1020_v27, 1  ;;  %v3112_v45 = vld [vmem:[#allocation22_spill] sm:$0xff] }
 0x114   : > { %v782_v28 = vpop.permute.xlu1 %781 }
 0x115   : > { %v1507_v35 = vmul.f32 0.0625, %v1409_v4  ;;  %v1215_v55 = vrot.slane %v1019_v9, 1  ;;  %1607 = vst.msk [vmem:[%s2432_s22 + $0x188] sm:$0x7f] %vm1557_vm0, %v1508_v62  ;;  %v1412_v53 = vadd.f32 %v1216_v19, %v1020_v27  ;;  %v1022_v52 = vadd.f32 %v782_v28, %v3110_v34  ;;  %v3115_v34 = vld [vmem:[#allocation25_spill] sm:$0xff] }
 0x116   : > { %v780_v41 = vpop.permute.xlu0 %779 }
 0x117   : > { %1606 = vst.msk [vmem:[%s2432_s22 + $0x180] sm:$0x7f] %vm1557_vm0, %v1507_v35  ;;  %v1411_v17 = vadd.f32 %v1215_v55, %v1019_v9  ;;  %v1021_v14 = vadd.f32 %v780_v41, %v3111_v0  ;;  %v1510_v33 = vmul.f32 0.0625, %v1412_v53  ;;  %v1218_v39 = vrot.slane %v1022_v52, 1  ;;  %v3114_v35 = vld [vmem:[#allocation24_spill] sm:$0xff] }
 0x118   : > { %v786_v2 = vpop.permute.xlu1 %785 }
 0x119   : > { %v1509_v56 = vmul.f32 0.0625, %v1411_v17  ;;  %v1217_v30 = vrot.slane %v1021_v14, 1  ;;  %1609 = vst.msk [vmem:[%s2432_s22 + $0x198] sm:$0x7f] %vm1557_vm0, %v1510_v33  ;;  %v1414_v48 = vadd.f32 %v1218_v39, %v1022_v52  ;;  %v1024_v25 = vadd.f32 %v786_v2, %v3112_v45 }
 0x11a   : > { %v784_v6 = vpop.permute.xlu0 %783 }
 0x11b   : > { %1608 = vst.msk [vmem:[%s2432_s22 + $0x190] sm:$0x7f] %vm1557_vm0, %v1509_v56  ;;  %v1413_v36 = vadd.f32 %v1217_v30, %v1021_v14  ;;  %v1023_v27 = vadd.f32 %v784_v6, %v3113_v31  ;;  %v1512_v37 = vmul.f32 0.0625, %v1414_v48  ;;  %v1220_v4 = vrot.slane %v1024_v25, 1  ;;  %v3116_v56 = vld [vmem:[#allocation26_spill] sm:$0xff] }
 0x11c   : > { %v790_v62 = vpop.permute.xlu1 %789 }
 0x11d   : > { %v1511_v51 = vmul.f32 0.0625, %v1413_v36  ;;  %v1219_v9 = vrot.slane %v1023_v27, 1  ;;  %1611 = vst.msk [vmem:[%s2432_s22 + $0x1a8] sm:$0x7f] %vm1557_vm0, %v1512_v37  ;;  %v1416_v19 = vadd.f32 %v1220_v4, %v1024_v25  ;;  %v1026_v55 = vadd.f32 %v790_v62, %v3114_v35  ;;  %v3117_v4 = vld [vmem:[#allocation27_spill] sm:$0xff] }
 0x11e   : > { %v788_v28 = vpop.permute.xlu0 %787 }
 0x11f   : > { %1610 = vst.msk [vmem:[%s2432_s22 + $0x1a0] sm:$0x7f] %vm1557_vm0, %v1511_v51  ;;  %v1415_v53 = vadd.f32 %v1219_v9, %v1023_v27  ;;  %v1025_v52 = vadd.f32 %v788_v28, %v3115_v34  ;;  %v1514_v41 = vmul.f32 0.0625, %v1416_v19  ;;  %v1222_v17 = vrot.slane %v1026_v55, 1 }
 0x120   : > { %v794_v33 = vpop.permute.xlu1 %793 }
 0x121   : > { %v1513_v0 = vmul.f32 0.0625, %v1415_v53  ;;  %v1221_v14 = vrot.slane %v1025_v52, 1  ;;  %1613 = vst.msk [vmem:[%s2432_s22 + $0x1b8] sm:$0x7f] %vm1557_vm0, %v1514_v41  ;;  %v1418_v39 = vadd.f32 %v1222_v17, %v1026_v55  ;;  %v1028_v30 = vadd.f32 %v794_v33, %v3116_v56 }
 0x122   : > { %v792_v2 = vpop.permute.xlu0 %791 }
 0x123   : > { %1612 = vst.msk [vmem:[%s2432_s22 + $0x1b0] sm:$0x7f] %vm1557_vm0, %v1513_v0  ;;  %v1417_v48 = vadd.f32 %v1221_v14, %v1025_v52  ;;  %v1027_v45 = vadd.f32 %v792_v2, %v2401_v38  ;;  %v1516_v25 = vmul.f32 0.0625, %v1418_v39  ;;  %v1224_v6 = vrot.slane %v1028_v30, 1 }
 0x124   : > { %v798_v27 = vpop.permute.xlu1 %797 }
 0x125   : > { %v1515_v36 = vmul.f32 0.0625, %v1417_v48  ;;  %v1223_v31 = vrot.slane %v1027_v45, 1  ;;  %1615 = vst.msk [vmem:[%s2432_s22 + $0x1c8] sm:$0x7f] %vm1557_vm0, %v1516_v25  ;;  %v1420_v37 = vadd.f32 %v1224_v6, %v1028_v30  ;;  %v1030_v51 = vadd.f32 %v798_v27, %v3117_v4 }
 0x126   : > { %v796_v9 = vpop.permute.xlu0 %795 }
 0x127   : > { %1614 = vst.msk [vmem:[%s2432_s22 + $0x1c0] sm:$0x7f] %vm1557_vm0, %v1515_v36  ;;  %v1419_v62 = vadd.f32 %v1223_v31, %v1027_v45  ;;  %v1029_v19 = vadd.f32 %v796_v9, %v2417_v63  ;;  %v1518_v35 = vmul.f32 0.0625, %v1420_v37  ;;  %v1226_v38 = vrot.slane %v1030_v51, 1  ;;  %v3118_v45 = vld [vmem:[#allocation28_spill] sm:$0xff] }
 0x128   : > { %v802_v53 = vpop.permute.xlu1 %801 }
 0x129   : > { %v1517_v55 = vmul.f32 0.0625, %v1419_v62  ;;  %v1225_v28 = vrot.slane %v1029_v19, 1  ;;  %1617 = vst.msk [vmem:[%s2432_s22 + $0x1d8] sm:$0x7f] %vm1557_vm0, %v1518_v35  ;;  %v1422_v34 = vadd.f32 %v1226_v38, %v1030_v51  ;;  %v1032_v52 = vadd.f32 %v802_v53, %v2427_v44 }
 0x12a   : > { %v800_v41 = vpop.permute.xlu0 %799 }
 0x12b   : > { %1616 = vst.msk [vmem:[%s2432_s22 + $0x1d0] sm:$0x7f] %vm1557_vm0, %v1517_v55  ;;  %v1421_v17 = vadd.f32 %v1225_v28, %v1029_v19  ;;  %v1031_v0 = vadd.f32 %v800_v41, %v2444_v20  ;;  %v1520_v14 = vmul.f32 0.0625, %v1422_v34  ;;  %v1228_v63 = vrot.slane %v1032_v52, 1 }
 0x12c   : > { %v806_v56 = vpop.permute.xlu1 %805 }
 0x12d   : > { %v1519_v33 = vmul.f32 0.0625, %v1421_v17  ;;  %v1227_v39 = vrot.slane %v1031_v0, 1  ;;  %1619 = vst.msk [vmem:[%s2432_s22 + $0x1e8] sm:$0x7f] %vm1557_vm0, %v1520_v14  ;;  %v1424_v30 = vadd.f32 %v1228_v63, %v1032_v52  ;;  %v1034_v2 = vadd.f32 %v806_v56, %v2458_v23 }
 0x12e   : > { %v804_v48 = vpop.permute.xlu0 %803 }
 0x12f   : > { %1618 = vst.msk [vmem:[%s2432_s22 + $0x1e0] sm:$0x7f] %vm1557_vm0, %v1519_v33  ;;  %v1423_v44 = vadd.f32 %v1227_v39, %v1031_v0  ;;  %v1033_v25 = vadd.f32 %v804_v48, %v3118_v45  ;;  %v1522_v6 = vmul.f32 0.0625, %v1424_v30  ;;  %v1230_v20 = vrot.slane %v1034_v2, 1 }
 0x130   : > { %v810_v27 = vpop.permute.xlu1 %809 }
 0x131   : > { %v1521_v36 = vmul.f32 0.0625, %v1423_v44  ;;  %v1229_v31 = vrot.slane %v1033_v25, 1  ;;  %1621 = vst.msk [vmem:[%s2432_s22 + $0x1f8] sm:$0x7f] %vm1557_vm0, %v1522_v6  ;;  %v1426_v37 = vadd.f32 %v1230_v20, %v1034_v2  ;;  %v1036_v4 = vadd.f32 %v810_v27, %v2481_v8 }
 0x132   : > { %v808_v51 = vpop.permute.xlu0 %807 }
 0x133   : > { %1620 = vst.msk [vmem:[%s2432_s22 + $0x1f0] sm:$0x7f] %vm1557_vm0, %v1521_v36  ;;  %v1425_v23 = vadd.f32 %v1229_v31, %v1033_v25  ;;  %v1035_v9 = vadd.f32 %v808_v51, %v2490_v3  ;;  %v1524_v62 = vmul.f32 0.0625, %v1426_v37  ;;  %v1232_v19 = vrot.slane %v1036_v4, 1 }
 0x134   : > { %v814_v55 = vpop.permute.xlu1 %813 }
 0x135   : > { %v1523_v35 = vmul.f32 0.0625, %v1425_v23  ;;  %v1231_v38 = vrot.slane %v1035_v9, 1  ;;  %1623 = vst.msk [vmem:[%s2432_s22 + $0x208] sm:$0x7f] %vm1557_vm0, %v1524_v62  ;;  %v1428_v28 = vadd.f32 %v1232_v19, %v1036_v4  ;;  %v1038_v53 = vadd.f32 %v814_v55, %v2508_v18 }
 0x136   : > { %v812_v34 = vpop.permute.xlu0 %811 }
 0x137   : > { %1622 = vst.msk [vmem:[%s2432_s22 + $0x200] sm:$0x7f] %vm1557_vm0, %v1523_v35  ;;  %v1427_v8 = vadd.f32 %v1231_v38, %v1035_v9  ;;  %v1037_v52 = vadd.f32 %v812_v34, %v2517_v43  ;;  %v1526_v41 = vmul.f32 0.0625, %v1428_v28  ;;  %v1234_v3 = vrot.slane %v1038_v53, 1 }
 0x138   : > { %v818_v14 = vpop.permute.xlu1 %817 }
 0x139   : > { %v1525_v17 = vmul.f32 0.0625, %v1427_v8  ;;  %v1233_v0 = vrot.slane %v1037_v52, 1  ;;  %1625 = vst.msk [vmem:[%s2432_s22 + $0x218] sm:$0x7f] %vm1557_vm0, %v1526_v41  ;;  %v1430_v63 = vadd.f32 %v1234_v3, %v1038_v53  ;;  %v1040_v33 = vadd.f32 %v818_v14, %v2534_v54 }
 0x13a   : > { %v816_v39 = vpop.permute.xlu0 %815 }
 0x13b   : > { %1624 = vst.msk [vmem:[%s2432_s22 + $0x210] sm:$0x7f] %vm1557_vm0, %v1525_v17  ;;  %v1429_v18 = vadd.f32 %v1233_v0, %v1037_v52  ;;  %v1039_v56 = vadd.f32 %v816_v39, %v2543_v46  ;;  %v1528_v30 = vmul.f32 0.0625, %v1430_v63  ;;  %v1236_v43 = vrot.slane %v1040_v33, 1 }
 0x13c   : > { %v822_v44 = vpop.permute.xlu1 %821 }
 0x13d   : > { %v1527_v2 = vmul.f32 0.0625, %v1429_v18  ;;  %v1235_v48 = vrot.slane %v1039_v56, 1  ;;  %1627 = vst.msk [vmem:[%s2432_s22 + $0x228] sm:$0x7f] %vm1557_vm0, %v1528_v30  ;;  %v1432_v45 = vadd.f32 %v1236_v43, %v1040_v33  ;;  %v1042_v25 = vadd.f32 %v822_v44, %v2558_v22 }
 0x13e   : > { %v820_v6 = vpop.permute.xlu0 %819 }
 0x13f   : > { %1626 = vst.msk [vmem:[%s2432_s22 + $0x220] sm:$0x7f] %vm1557_vm0, %v1527_v2  ;;  %v1431_v54 = vadd.f32 %v1235_v48, %v1039_v56  ;;  %v1041_v20 = vadd.f32 %v820_v6, %v2570_v59  ;;  %v1530_v36 = vmul.f32 0.0625, %v1432_v45  ;;  %v1238_v46 = vrot.slane %v1042_v25, 1 }
 0x140   : > { %v826_v37 = vpop.permute.xlu1 %825 }
 0x141   : > { %v1529_v31 = vmul.f32 0.0625, %v1431_v54  ;;  %v1237_v27 = vrot.slane %v1041_v20, 1  ;;  %1629 = vst.msk [vmem:[%s2432_s22 + $0x238] sm:$0x7f] %vm1557_vm0, %v1530_v36  ;;  %v1434_v4 = vadd.f32 %v1238_v46, %v1042_v25  ;;  %v1044_v51 = vadd.f32 %v826_v37, %v2587_v10 }
 0x142   : > { %v824_v23 = vpop.permute.xlu0 %823 }
 0x143   : > { %1628 = vst.msk [vmem:[%s2432_s22 + $0x230] sm:$0x7f] %vm1557_vm0, %v1529_v31  ;;  %v1433_v22 = vadd.f32 %v1237_v27, %v1041_v20  ;;  %v1043_v9 = vadd.f32 %v824_v23, %v2591_v24  ;;  %v1532_v62 = vmul.f32 0.0625, %v1434_v4  ;;  %v1240_v59 = vrot.slane %v1044_v51, 1  ;;  %v3119_v23 = vld [vmem:[#allocation29_spill] sm:$0xff] }
 0x144   : > { %v830_v38 = vpop.permute.xlu1 %829 }
 0x145   : > { %v1531_v19 = vmul.f32 0.0625, %v1433_v22  ;;  %v1239_v35 = vrot.slane %v1043_v9, 1  ;;  %1631 = vst.msk [vmem:[%s2432_s22 + $0x248] sm:$0x7f] %vm1557_vm0, %v1532_v62  ;;  %v1436_v55 = vadd.f32 %v1240_v59, %v1044_v51  ;;  %v1046_v28 = vadd.f32 %v830_v38, %v2604_v50 }
 0x146   : > { %v828_v53 = vpop.permute.xlu0 %827 }
 0x147   : > { %1630 = vst.msk [vmem:[%s2432_s22 + $0x240] sm:$0x7f] %vm1557_vm0, %v1531_v19  ;;  %v1435_v10 = vadd.f32 %v1239_v35, %v1043_v9  ;;  %v1045_v34 = vadd.f32 %v828_v53, %v2620_v15  ;;  %v1534_v8 = vmul.f32 0.0625, %v1436_v55  ;;  %v1242_v24 = vrot.slane %v1046_v28, 1 }
 0x148   : > { %v834_v3 = vpop.permute.xlu1 %833 }
 0x149   : > { %v1533_v52 = vmul.f32 0.0625, %v1435_v10  ;;  %v1241_v41 = vrot.slane %v1045_v34, 1  ;;  %1633 = vst.msk [vmem:[%s2432_s22 + $0x258] sm:$0x7f] %vm1557_vm0, %v1534_v8  ;;  %v1438_v17 = vadd.f32 %v1242_v24, %v1046_v28  ;;  %v1048_v0 = vadd.f32 %v834_v3, %v2635_v32 }
 0x14a   : > { %v832_v14 = vpop.permute.xlu0 %831 }
 0x14b   : > { %1632 = vst.msk [vmem:[%s2432_s22 + $0x250] sm:$0x7f] %vm1557_vm0, %v1533_v52  ;;  %v1437_v50 = vadd.f32 %v1241_v41, %v1045_v34  ;;  %v1047_v63 = vadd.f32 %v832_v14, %v2644_v40  ;;  %v1536_v33 = vmul.f32 0.0625, %v1438_v17  ;;  %v1244_v15 = vrot.slane %v1048_v0, 1 }
 0x14c   : > { %v838_v56 = vpop.permute.xlu1 %837 }
 0x14d   : > { %v1535_v39 = vmul.f32 0.0625, %v1437_v50  ;;  %v1243_v18 = vrot.slane %v1047_v63, 1  ;;  %1635 = vst.msk [vmem:[%s2432_s22 + $0x268] sm:$0x7f] %vm1557_vm0, %v1536_v33  ;;  %v1440_v30 = vadd.f32 %v1244_v15, %v1048_v0  ;;  %v1050_v43 = vadd.f32 %v838_v56, %v2659_v29 }
 0x14e   : > { %v836_v2 = vpop.permute.xlu0 %835 }
 0x14f   : > { %1634 = vst.msk [vmem:[%s2432_s22 + $0x260] sm:$0x7f] %vm1557_vm0, %v1535_v39  ;;  %v1439_v32 = vadd.f32 %v1243_v18, %v1047_v63  ;;  %v1049_v48 = vadd.f32 %v836_v2, %v2668_v49  ;;  %v1538_v44 = vmul.f32 0.0625, %v1440_v30  ;;  %v1246_v40 = vrot.slane %v1050_v43, 1 }
 0x150   : > { %v842_v6 = vpop.permute.xlu1 %841 }
 0x151   : > { %v1537_v45 = vmul.f32 0.0625, %v1439_v32  ;;  %v1245_v25 = vrot.slane %v1049_v48, 1  ;;  %1637 = vst.msk [vmem:[%s2432_s22 + $0x278] sm:$0x7f] %vm1557_vm0, %v1538_v44  ;;  %v1442_v54 = vadd.f32 %v1246_v40, %v1050_v43  ;;  %v1052_v20 = vadd.f32 %v842_v6, %v2686_v60 }
 0x152   : > { %v840_v36 = vpop.permute.xlu0 %839 }
 0x153   : > { %1636 = vst.msk [vmem:[%s2432_s22 + $0x270] sm:$0x7f] %vm1557_vm0, %v1537_v45  ;;  %v1441_v29 = vadd.f32 %v1245_v25, %v1049_v48  ;;  %v1051_v46 = vadd.f32 %v840_v36, %v2698_v5  ;;  %v1540_v31 = vmul.f32 0.0625, %v1442_v54  ;;  %v1248_v49 = vrot.slane %v1052_v20, 1 }
 0x154   : > { %v846_v4 = vpop.permute.xlu1 %845 }
 0x155   : > { %v1539_v27 = vmul.f32 0.0625, %v1441_v29  ;;  %v1247_v37 = vrot.slane %v1051_v46, 1  ;;  %1639 = vst.msk [vmem:[%s2432_s22 + $0x288] sm:$0x7f] %vm1557_vm0, %v1540_v31  ;;  %v1444_v51 = vadd.f32 %v1248_v49, %v1052_v20  ;;  %v1054_v22 = vadd.f32 %v846_v4, %v3119_v23 }
 0x156   : > { %v844_v9 = vpop.permute.xlu0 %843 }
 0x157   : > { %1638 = vst.msk [vmem:[%s2432_s22 + $0x280] sm:$0x7f] %vm1557_vm0, %v1539_v27  ;;  %v1443_v60 = vadd.f32 %v1247_v37, %v1051_v46  ;;  %v1053_v62 = vadd.f32 %v844_v9, %v2718_v1  ;;  %v1542_v59 = vmul.f32 0.0625, %v1444_v51  ;;  %v1250_v5 = vrot.slane %v1054_v22, 1 }
 0x158   : > { %v850_v38 = vpop.permute.xlu1 %849 }
 0x159   : > { %v1541_v19 = vmul.f32 0.0625, %v1443_v60  ;;  %v1249_v35 = vrot.slane %v1053_v62, 1  ;;  %1641 = vst.msk [vmem:[%s2432_s22 + $0x298] sm:$0x7f] %vm1557_vm0, %v1542_v59  ;;  %v1446_v55 = vadd.f32 %v1250_v5, %v1054_v22  ;;  %v1056_v28 = vadd.f32 %v850_v38, %v2729_v21 }
 0x15a   : > { %v848_v53 = vpop.permute.xlu0 %847 }
 0x15b   : > { %1640 = vst.msk [vmem:[%s2432_s22 + $0x290] sm:$0x7f] %vm1557_vm0, %v1541_v19  ;;  %v1445_v10 = vadd.f32 %v1249_v35, %v1053_v62  ;;  %v1055_v34 = vadd.f32 %v848_v53, %v2744_v16  ;;  %v1544_v8 = vmul.f32 0.0625, %v1446_v55  ;;  %v1252_v1 = vrot.slane %v1056_v28, 1 }
 0x15c   : > { %v854_v41 = vpop.permute.xlu1 %853 }
 0x15d   : > { %v1543_v24 = vmul.f32 0.0625, %v1445_v10  ;;  %v1251_v52 = vrot.slane %v1055_v34, 1  ;;  %1643 = vst.msk [vmem:[%s2432_s22 + $0x2a8] sm:$0x7f] %vm1557_vm0, %v1544_v8  ;;  %v1448_v3 = vadd.f32 %v1252_v1, %v1056_v28  ;;  %v1058_v17 = vadd.f32 %v854_v41, %v2759_v58 }
 0x15e   : > { %v852_v0 = vpop.permute.xlu0 %851 }
 0x15f   : > { %1642 = vst.msk [vmem:[%s2432_s22 + $0x2a0] sm:$0x7f] %vm1557_vm0, %v1543_v24  ;;  %v1447_v21 = vadd.f32 %v1251_v52, %v1055_v34  ;;  %v1057_v14 = vadd.f32 %v852_v0, %v2763_v57  ;;  %v1546_v50 = vmul.f32 0.0625, %v1448_v3  ;;  %v1254_v16 = vrot.slane %v1058_v17, 1 }
 0x160   : > { %v858_v15 = vpop.permute.xlu1 %857 }
 0x161   : > { %v1545_v63 = vmul.f32 0.0625, %v1447_v21  ;;  %v1253_v33 = vrot.slane %v1057_v14, 1  ;;  %1645 = vst.msk [vmem:[%s2432_s22 + $0x2b8] sm:$0x7f] %vm1557_vm0, %v1546_v50  ;;  %v1450_v39 = vadd.f32 %v1254_v16, %v1058_v17  ;;  %v1060_v18 = vadd.f32 %v858_v15, %v2772_v13 }
 0x162   : > { %v856_v56 = vpop.permute.xlu0 %855 }
 0x163   : > { %1644 = vst.msk [vmem:[%s2432_s22 + $0x2b0] sm:$0x7f] %vm1557_vm0, %v1545_v63  ;;  %v1449_v58 = vadd.f32 %v1253_v33, %v1057_v14  ;;  %v1059_v30 = vadd.f32 %v856_v56, %v2785_v42  ;;  %v1548_v43 = vmul.f32 0.0625, %v1450_v39  ;;  %v1256_v57 = vrot.slane %v1060_v18, 1 }
 0x164   : > { %v862_v48 = vpop.permute.xlu1 %861 }
 0x165   : > { %v1547_v2 = vmul.f32 0.0625, %v1449_v58  ;;  %v1255_v32 = vrot.slane %v1059_v30, 1  ;;  %1647 = vst.msk [vmem:[%s2432_s22 + $0x2c8] sm:$0x7f] %vm1557_vm0, %v1548_v43  ;;  %v1452_v44 = vadd.f32 %v1256_v57, %v1060_v18  ;;  %v1062_v40 = vadd.f32 %v862_v48, %v2797_v61 }
 0x166   : > { %v860_v45 = vpop.permute.xlu0 %859 }
 0x167   : > { %1646 = vst.msk [vmem:[%s2432_s22 + $0x2c0] sm:$0x7f] %vm1557_vm0, %v1547_v2  ;;  %v1451_v13 = vadd.f32 %v1255_v32, %v1059_v30  ;;  %v1061_v25 = vadd.f32 %v860_v45, %v2801_v12  ;;  %v1550_v6 = vmul.f32 0.0625, %v1452_v44  ;;  %v1258_v42 = vrot.slane %v1062_v40, 1 }
 0x168   : > { %v866_v36 = vpop.permute.xlu1 %865 }
 0x169   : > { %v1549_v54 = vmul.f32 0.0625, %v1451_v13  ;;  %v1257_v20 = vrot.slane %v1061_v25, 1  ;;  %1649 = vst.msk [vmem:[%s2432_s22 + $0x2d8] sm:$0x7f] %vm1557_vm0, %v1550_v6  ;;  %v1454_v29 = vadd.f32 %v1258_v42, %v1062_v40  ;;  %v1064_v46 = vadd.f32 %v866_v36, %v2808_v11 }
 0x16a   : > { %v864_v31 = vpop.permute.xlu0 %863 }
 0x16b   : > { %1648 = vst.msk [vmem:[%s2432_s22 + $0x2d0] sm:$0x7f] %vm1557_vm0, %v1549_v54  ;;  %v1453_v61 = vadd.f32 %v1257_v20, %v1061_v25  ;;  %v1063_v49 = vadd.f32 %v864_v31, %v2819_v26  ;;  %v1552_v27 = vmul.f32 0.0625, %v1454_v29  ;;  %v1260_v12 = vrot.slane %v1064_v46, 1 }
 0x16c   : > { %v870_v51 = vpop.permute.xlu1 %869 }
 0x16d   : > { %v1551_v37 = vmul.f32 0.0625, %v1453_v61  ;;  %v1259_v4 = vrot.slane %v1063_v49, 1  ;;  %1651 = vst.msk [vmem:[%s2432_s22 + $0x2e8] sm:$0x7f] %vm1557_vm0, %v1552_v27  ;;  %v1456_v23 = vadd.f32 %v1260_v12, %v1064_v46  ;;  %v1066_v22 = vadd.f32 %v870_v51, %v2829_v7 }
 0x16e   : > { %v868_v11 = vpop.permute.xlu0 %867 }
 0x16f   : > { %1650 = vst.msk [vmem:[%s2432_s22 + $0x2e0] sm:$0x7f] %vm1557_vm0, %v1551_v37  ;;  %v1455_v9 = vadd.f32 %v1259_v4, %v1063_v49  ;;  %v1065_v26 = vadd.f32 %v868_v11, %v2833_v47  ;;  %v1554_v60 = vmul.f32 0.0625, %v1456_v23  ;;  %v1262_v62 = vrot.slane %v1066_v22, 1 }
 0x171   : > { %v1553_v59 = vmul.f32 0.0625, %v1455_v9  ;;  %v1261_v5 = vrot.slane %v1065_v26, 1  ;;  %1653 = vst.msk [vmem:[%s2432_s22 + $0x2f8] sm:$0x7f] %vm1557_vm0, %v1554_v60  ;;  %v1458_v19 = vadd.f32 %v1262_v62, %v1066_v22 }
 0x173   : > { %1652 = vst.msk [vmem:[%s2432_s22 + $0x2f0] sm:$0x7f] %vm1557_vm0, %v1553_v59  ;;  %v1457_v35 = vadd.f32 %v1261_v5, %v1065_v26  ;;  %v1556_v38 = vmul.f32 0.0625, %v1458_v19 }
 0x175   : > { %v1555_v55 = vmul.f32 0.0625, %v1457_v35  ;;  %1655 = vst.msk [vmem:[%s2432_s22 + $0x308] sm:$0x7f] %vm1557_vm0, %v1556_v38 }
 0x177   : > { %1654 = vst.msk [vmem:[%s2432_s22 + $0x300] sm:$0x7f] %vm1557_vm0, %v1555_v55 }
 0x178 PF: > { %p11_p8 = scmp.ge.s32.totalorder %s1996_s11, 6   ;;  %s3120_s6 = smov %s1952_s7 }
 0x179   : > { %s3121_s7 = smov %s1956_s8  ;;  %s3122_s8 = smov %s2006_s14 }
 0x17a   : > { %s3123_s9 = smov %s1996_s11  ;;  %13 = sbr.rel (!%p11_p8) target bundleno = 3 (0x3), region = 65 }
 0x181   :  { %1680 = vsyncpa [#allocation3], 1 }
 0x182   :  { %1682 = vsyncpa [#allocation3 + $0x1], 1 }

</bundles_post_ra>
